<compile_context>
chip_gen: v7x
topology: tpu7x:2x2x1
jax: 0.10.0
libtpu: 0.0.40
codegen_flags: <defaults>
</compile_context>

<pallas_src>
import functools
import math

import jax
import jax.numpy as jnp
from jax import lax
from jax.experimental import pallas as pl
from jax.experimental.pallas import tpu as pltpu


def _round_up(n, m):
    return ((n + m - 1) // m) * m


def _vmem_limit_bytes():
    cap = 64 * 1024 * 1024
    try:
        info_fn = getattr(pltpu, "get_tpu_info", None)
        if info_fn is not None:
            cap = int(getattr(info_fn(), "vmem_capacity_bytes", cap))
    except Exception:
        pass
    return int(min(cap * 3 // 4, 100 * 1024 * 1024))


# --------------------------------------------------------------------------
# Fused kernel: conv3x3 -> (+bias+time-emb) -> SiLU -> conv3x3 -> (+bias)
# One grid step = one sample, full image, h stays in VMEM.
# --------------------------------------------------------------------------
def _fused_score_kernel(x_ref, f_ref, m_ref, w1_ref, be1_ref, w2_ref, b2_ref,
                        o_ref, pad1_ref, pad2_ref, *, C, hidden, H, W, Wg):
    # x_ref  : (1, C, HW)        f32   one sample, channel-major, HW on lanes
    # f_ref  : (1, HW)           bf16  forcing channel (resident)
    # m_ref  : (2, HW)           bf16  width-validity masks for ox = -1 / +1
    # w1_ref : (9, hidden, C+1)  bf16  conv1 weights, tap-major
    # be1_ref: (1, hidden, 1)    f32   bias1 + per-sample time embedding
    # w2_ref : (9, C, hidden)    bf16  conv2 weights (forcing out-channel dropped)
    # b2_ref : (1, C, 1)         f32
    # o_ref  : (1, C, HW)        f32
    # pad1_ref: (C+1,   HW+2*Wg) bf16  zero-guarded conv1 input scratch
    # pad2_ref: (hidden,HW+2*Wg) bf16  zero-guarded conv2 input scratch
    HW = H * W
    Cin = C + 1

    mask_l = m_ref[0:1, :]        # valid lanes for ox = -1 taps
    mask_r = m_ref[1:2, :]        # valid lanes for ox = +1 taps

    def zero_guards(pad, rows):
        pad[:, 0:Wg] = jnp.zeros((rows, Wg), jnp.bfloat16)
        pad[:, Wg + HW:Wg + HW + Wg] = jnp.zeros((rows, Wg), jnp.bfloat16)

    def conv3x3(pad, w):
        """SAME 3x3 conv: 9 static window loads of the guarded scratch, one
        small MXU matmul per tap, f32 accumulation."""
        acc = None
        ti = 0
        for oy in (-1, 0, 1):
            for ox in (-1, 0, 1):
                off = Wg + oy * W + ox
                piece = pad[:, off:off + HW]              # (K, HW) bf16 window
                if ox == -1:
                    piece = piece * mask_l
                elif ox == 1:
                    piece = piece * mask_r
                p = jnp.dot(w[ti], piece, preferred_element_type=jnp.float32)
                acc = p if acc is None else acc + p
                ti += 1
        return acc

    # ---- conv1: [x, forcing] -> hidden, + bias + time-emb, SiLU -------------
    zero_guards(pad1_ref, Cin)
    pad1_ref[0:C, Wg:Wg + HW] = x_ref[0].astype(jnp.bfloat16)
    pad1_ref[C:Cin, Wg:Wg + HW] = f_ref[...]

    acc1 = conv3x3(pad1_ref, w1_ref) + be1_ref[0]          # (hidden, HW) f32
    sig = pl.reciprocal(1.0 + jnp.exp(-acc1), approx=True)  # EUP-only sigmoid
    h = (acc1 * sig).astype(jnp.bfloat16)                   # SiLU; stays in VMEM

    # ---- conv2: hidden -> C (forcing output channel never computed) --------
    zero_guards(pad2_ref, hidden)
    pad2_ref[:, Wg:Wg + HW] = h

    acc2 = conv3x3(pad2_ref, w2_ref) + b2_ref[0]           # (C, HW) f32
    o_ref[0] = acc2.astype(o_ref.dtype)


# --------------------------------------------------------------------------
# Parameters / glue
# --------------------------------------------------------------------------
def time_embed(t, dim):
    half = dim // 2
    freqs = jnp.exp(-jnp.log(10000.0)
                    * jnp.arange(half, dtype=jnp.float32) / half)
    ang = t[:, None] * freqs[None, :]
    return jnp.concatenate([jnp.sin(ang), jnp.cos(ang)], axis=-1)   # (B, dim)


def init_params(features, size, hidden, time_dim, key):
    cin = features + 1  # SpecialScoreUNet: ScoreUNet(net, features + 1)
    k1, k2, k3 = jax.random.split(key, 3)
    # forcing buffer: sin(4 * domain) expanded to (1, size, size),
    # varying along the last (width) axis — matches torch.expand semantics.
    domain = 2.0 * jnp.pi / size * (jnp.arange(size, dtype=jnp.float32) + 0.5)
    forcing = jnp.broadcast_to(jnp.sin(4.0 * domain), (1, size, size))
    return dict(
        forcing=forcing,
        w1=0.1 * jax.random.normal(k1, (hidden, cin, 3, 3), jnp.float32),
        b1=jnp.zeros((hidden,), jnp.float32),
        w2=0.1 * jax.random.normal(k2, (cin, hidden, 3, 3), jnp.float32),
        b2=jnp.zeros((cin,), jnp.float32),
        wt=0.1 * jax.random.normal(k3, (time_dim, hidden), jnp.float32),
        bt=jnp.zeros((hidden,), jnp.float32),
    )


def special_score_unet_forward(params, x, t):
    """x: (*batch, C, H, W) NCHW, t: (prod(batch),). Returns array like x."""
    H, W = x.shape[-2:]
    C = x.shape[-3]
    batch_shape = x.shape[:-3]
    HW = H * W
    B = math.prod(batch_shape) if batch_shape else 1
    hidden = params["w1"].shape[0]
    Cin = C + 1
    assert params["w1"].shape[1] == Cin
    assert params["forcing"].shape[-2:] == (H, W)

    # flatten leading batch dims + spatial dims (pure metadata reshapes)
    y = x.reshape(B, C, HW).astype(jnp.float32)

    # bias1 + per-sample time embedding, folded into one (B, hidden, 1) operand
    emb = (time_embed(t.reshape(-1).astype(jnp.float32),
                      params["wt"].shape[0]) @ params["wt"] + params["bt"])
    be1 = (params["b1"][None, :] + emb)[:, :, None]

    # weights: (O, I, 3, 3) -> (9, O, I) tap-major, bf16 for the MXU.
    w1t = jnp.transpose(params["w1"], (2, 3, 0, 1)).reshape(9, hidden, Cin)
    w1t = w1t.astype(jnp.bfloat16)
    # conv2: drop the forcing output channel up-front (exactly equivalent to
    # slicing o[..., :-1, :, :] afterwards, but never computes/stores it).
    w2t = jnp.transpose(params["w2"][:C], (2, 3, 0, 1)).reshape(9, C, hidden)
    w2t = w2t.astype(jnp.bfloat16)
    b2c = params["b2"][:C][None, :, None]                      # (1, C, 1)

    # forcing channel, flattened row-major (tiny resident operand)
    f_flat = params["forcing"].reshape(1, HW).astype(jnp.bfloat16)

    # width-validity multiply-masks for the ox = -1 / +1 taps
    xcol = jnp.arange(HW, dtype=jnp.int32) % W
    masks = jnp.stack([(xcol >= 1), (xcol <= W - 2)],
                      axis=0).astype(jnp.bfloat16)             # (2, HW)

    Wg = _round_up(W + 1, 128)   # 128-aligned zero-guard band on each side

    kernel = functools.partial(_fused_score_kernel, C=C, hidden=hidden,
                               H=H, W=W, Wg=Wg)

    out = pl.pallas_call(
        kernel,
        out_shape=jax.ShapeDtypeStruct((B, C, HW), jnp.float32),
        grid=(B,),
        in_specs=[
            pl.BlockSpec((1, C, HW), lambda b: (b, 0, 0)),         # x (per sample)
            pl.BlockSpec((1, HW), lambda b: (0, 0)),               # forcing
            pl.BlockSpec((2, HW), lambda b: (0, 0)),               # width masks
            pl.BlockSpec((9, hidden, Cin), lambda b: (0, 0, 0)),   # conv1 weights
            pl.BlockSpec((1, hidden, 1), lambda b: (b, 0, 0)),     # bias1 + emb
            pl.BlockSpec((9, C, hidden), lambda b: (0, 0, 0)),     # conv2 weights
            pl.BlockSpec((1, C, 1), lambda b: (0, 0, 0)),          # bias2
        ],
        out_specs=pl.BlockSpec((1, C, HW), lambda b: (b, 0, 0)),
        scratch_shapes=[
            pltpu.VMEM((Cin, HW + 2 * Wg), jnp.bfloat16),          # conv1 pad buf
            pltpu.VMEM((hidden, HW + 2 * Wg), jnp.bfloat16),       # conv2 pad buf
        ],
        compiler_params=pltpu.CompilerParams(
            dimension_semantics=("parallel",),
            vmem_limit_bytes=_vmem_limit_bytes(),
        ),
    )(y, f_flat, masks, w1t, be1, w2t, b2c)

    return out.reshape(batch_shape + (C, H, W))


# --------------------------------------------------------------------------
# Pure-JAX reference (lax.conv, f32) for a correctness check
# --------------------------------------------------------------------------
def ref_forward(params, x, t):
    H, W = x.shape[-2:]
    batch_shape = x.shape[:-3]
    f = jnp.broadcast_to(params["forcing"], batch_shape + (1, H, W))
    xc = jnp.concatenate([x, f], axis=-3)
    y = xc.reshape((-1,) + xc.shape[-3:])
    emb = (time_embed(t.reshape(-1).astype(jnp.float32),
                      params["wt"].shape[0]) @ params["wt"] + params["bt"])
    dn = ("NCHW", "OIHW", "NCHW")
    h = lax.conv_general_dilated(y, params["w1"], (1, 1), "SAME",
                                 dimension_numbers=dn)
    h = h + params["b1"][None, :, None, None] + emb[:, :, None, None]
    h = h * jax.nn.sigmoid(h)
    o = lax.conv_general_dilated(h, params["w2"], (1, 1), "SAME",
                                 dimension_numbers=dn)
    o = o + params["b2"][None, :, None, None]
    o = o.reshape(xc.shape)
    return o[..., :-1, :, :]


# --------------------------------------------------------------------------
if __name__ == "__main__":
    B, C, size = 2, 4, 16          # batch, features, spatial size
    params = init_params(features=C, size=size, hidden=32, time_dim=16,
                         key=jax.random.PRNGKey(42))

    kx, kt = jax.random.split(jax.random.PRNGKey(0))
    x = jax.random.normal(kx, (B, C, size, size), dtype=jnp.float32)
    t = jax.random.uniform(kt, (B,), dtype=jnp.float32)

    fwd = jax.jit(special_score_unet_forward)
    out = jax.block_until_ready(fwd(params, x, t))

    assert out.shape == x.shape, (out.shape, x.shape)
    ref = ref_forward(params, x, t)
    err = float(jnp.max(jnp.abs(out - ref)))
    # bf16 MXU inputs (f32 accumulation / f32 epilogue) vs. pure-f32 reference:
    # use a bf16-appropriate tolerance; real bugs (tap misalignment) are O(0.1+).
    assert jnp.allclose(out, ref, atol=5e-2, rtol=5e-2), err

    print("KERNEL_OK")
</pallas_src>

<mosaic_0001>
module attributes {stable_mosaic.version = 11 : i64} {
  func.func @_fused_score_kernel(%arg0: i32, %arg1: memref<1x4x256xf32, #tpu.memory_space<vmem>>, %arg2: memref<1x256xbf16, #tpu.memory_space<vmem>>, %arg3: memref<2x256xbf16, #tpu.memory_space<vmem>>, %arg4: memref<9x32x5xbf16, #tpu.memory_space<vmem>>, %arg5: memref<1x32x1xf32, #tpu.memory_space<vmem>>, %arg6: memref<9x4x32xbf16, #tpu.memory_space<vmem>>, %arg7: memref<1x4x1xf32, #tpu.memory_space<vmem>>, %arg8: memref<1x4x256xf32, #tpu.memory_space<vmem>>, %arg9: memref<5x512xbf16, #tpu.memory_space<vmem>>, %arg10: memref<32x512xbf16, #tpu.memory_space<vmem>>) attributes {dimension_semantics = [#tpu.dimension_semantics<parallel>], iteration_bounds = array<i64: 2>, scalar_prefetch = 0 : i64, scratch_operands = 2 : i64, tpu.core_type = #tpu.core_type<tc>, window_params = [{transform_indices = @transform_0, window_bounds = array<i64: 1, 4, 256>}, {pipeline_mode = #tpu.pipeline_mode<synchronous>, transform_indices = @transform_1, window_bounds = array<i64: 1, 256>}, {pipeline_mode = #tpu.pipeline_mode<synchronous>, transform_indices = @transform_2, window_bounds = array<i64: 2, 256>}, {pipeline_mode = #tpu.pipeline_mode<synchronous>, transform_indices = @transform_3, window_bounds = array<i64: 9, 32, 5>}, {transform_indices = @transform_4, window_bounds = array<i64: 1, 32, 1>}, {pipeline_mode = #tpu.pipeline_mode<synchronous>, transform_indices = @transform_5, window_bounds = array<i64: 9, 4, 32>}, {pipeline_mode = #tpu.pipeline_mode<synchronous>, transform_indices = @transform_6, window_bounds = array<i64: 1, 4, 1>}, {transform_indices = @transform_7, window_bounds = array<i64: 1, 4, 256>}]} {
    %c0 = arith.constant 0 : index
    %c0_0 = arith.constant 0 : index
    %0 = vector.load %arg3[%c0, %c0_0] : memref<2x256xbf16, #tpu.memory_space<vmem>>, vector<1x256xbf16>
    %c1 = arith.constant 1 : index
    %c0_1 = arith.constant 0 : index
    %1 = vector.load %arg3[%c1, %c0_1] : memref<2x256xbf16, #tpu.memory_space<vmem>>, vector<1x256xbf16>
    %cst = arith.constant 0.000000e+00 : bf16
    %2 = vector.broadcast %cst : bf16 to vector<5x128xbf16>
    %c0_2 = arith.constant 0 : index
    %c0_3 = arith.constant 0 : index
    %3 = vector.load %arg9[%c0_2, %c0_3] : memref<5x512xbf16, #tpu.memory_space<vmem>>, vector<5x128xbf16>
    tpu.vector_store %arg9[%c0_2, %c0_3], %2 {strides = array<i32>} : memref<5x512xbf16, #tpu.memory_space<vmem>>, vector<5x128xbf16>,
    %cst_4 = arith.constant 0.000000e+00 : bf16
    %4 = vector.broadcast %cst_4 : bf16 to vector<5x128xbf16>
    %c0_5 = arith.constant 0 : index
    %c384 = arith.constant 384 : index
    %5 = vector.load %arg9[%c0_5, %c384] : memref<5x512xbf16, #tpu.memory_space<vmem>>, vector<5x128xbf16>
    tpu.vector_store %arg9[%c0_5, %c384], %4 {strides = array<i32>} : memref<5x512xbf16, #tpu.memory_space<vmem>>, vector<5x128xbf16>,
    %c0_6 = arith.constant 0 : index
    %c0_7 = arith.constant 0 : index
    %c0_8 = arith.constant 0 : index
    %6 = vector.load %arg1[%c0_6, %c0_7, %c0_8] : memref<1x4x256xf32, #tpu.memory_space<vmem>>, vector<1x4x256xf32>
    %7 = vector.shape_cast %6 : vector<1x4x256xf32> to vector<4x256xf32>
    %8 = arith.truncf %7 : vector<4x256xf32> to vector<4x256xbf16>
    %c0_9 = arith.constant 0 : index
    %c128 = arith.constant 128 : index
    %9 = vector.load %arg9[%c0_9, %c128] : memref<5x512xbf16, #tpu.memory_space<vmem>>, vector<4x256xbf16>
    tpu.vector_store %arg9[%c0_9, %c128], %8 {strides = array<i32>} : memref<5x512xbf16, #tpu.memory_space<vmem>>, vector<4x256xbf16>,
    %c0_10 = arith.constant 0 : index
    %c0_11 = arith.constant 0 : index
    %10 = vector.load %arg2[%c0_10, %c0_11] : memref<1x256xbf16, #tpu.memory_space<vmem>>, vector<1x256xbf16>
    %c4 = arith.constant 4 : index
    %c128_12 = arith.constant 128 : index
    %11 = vector.load %arg9[%c4, %c128_12] : memref<5x512xbf16, #tpu.memory_space<vmem>>, vector<1x256xbf16>
    tpu.vector_store %arg9[%c4, %c128_12], %10 {strides = array<i32>} : memref<5x512xbf16, #tpu.memory_space<vmem>>, vector<1x256xbf16>,
    %c0_13 = arith.constant 0 : index
    %c111 = arith.constant 111 : index
    %12 = vector.load %arg9[%c0_13, %c111] : memref<5x512xbf16, #tpu.memory_space<vmem>>, vector<5x256xbf16>
    %13 = vector.broadcast %0 : vector<1x256xbf16> to vector<5x256xbf16>
    %14 = arith.mulf %12, %13 : vector<5x256xbf16>
    %c0_14 = arith.constant 0 : index
    %c0_15 = arith.constant 0 : index
    %c0_16 = arith.constant 0 : index
    %15 = vector.load %arg4[%c0_14, %c0_15, %c0_16] : memref<9x32x5xbf16, #tpu.memory_space<vmem>>, vector<1x32x5xbf16>
    %16 = vector.shape_cast %15 : vector<1x32x5xbf16> to vector<32x5xbf16>
    %cst_17 = arith.constant dense<0.000000e+00> : vector<32x256xf32>
    %17 = tpu.matmul %16, %14, %cst_17 {dimension_numbers = #tpu.dot_dimension_numbers<[1], [0], [0], [1], [0, 0, 1, 1], [], []>} : vector<32x5xbf16>, vector<5x256xbf16>, vector<32x256xf32> -> vector<32x256xf32>
    %c0_18 = arith.constant 0 : index
    %c112 = arith.constant 112 : index
    %18 = vector.load %arg9[%c0_18, %c112] : memref<5x512xbf16, #tpu.memory_space<vmem>>, vector<5x256xbf16>
    %c1_19 = arith.constant 1 : index
    %c0_20 = arith.constant 0 : index
    %c0_21 = arith.constant 0 : index
    %19 = vector.load %arg4[%c1_19, %c0_20, %c0_21] : memref<9x32x5xbf16, #tpu.memory_space<vmem>>, vector<1x32x5xbf16>
    %20 = vector.shape_cast %19 : vector<1x32x5xbf16> to vector<32x5xbf16>
    %cst_22 = arith.constant dense<0.000000e+00> : vector<32x256xf32>
    %21 = tpu.matmul %20, %18, %cst_22 {dimension_numbers = #tpu.dot_dimension_numbers<[1], [0], [0], [1], [0, 0, 1, 1], [], []>} : vector<32x5xbf16>, vector<5x256xbf16>, vector<32x256xf32> -> vector<32x256xf32>
    %22 = arith.addf %17, %21 : vector<32x256xf32>
    %c0_23 = arith.constant 0 : index
    %c113 = arith.constant 113 : index
    %23 = vector.load %arg9[%c0_23, %c113] : memref<5x512xbf16, #tpu.memory_space<vmem>>, vector<5x256xbf16>
    %24 = vector.broadcast %1 : vector<1x256xbf16> to vector<5x256xbf16>
    %25 = arith.mulf %23, %24 : vector<5x256xbf16>
    %c2 = arith.constant 2 : index
    %c0_24 = arith.constant 0 : index
    %c0_25 = arith.constant 0 : index
    %26 = vector.load %arg4[%c2, %c0_24, %c0_25] : memref<9x32x5xbf16, #tpu.memory_space<vmem>>, vector<1x32x5xbf16>
    %27 = vector.shape_cast %26 : vector<1x32x5xbf16> to vector<32x5xbf16>
    %cst_26 = arith.constant dense<0.000000e+00> : vector<32x256xf32>
    %28 = tpu.matmul %27, %25, %cst_26 {dimension_numbers = #tpu.dot_dimension_numbers<[1], [0], [0], [1], [0, 0, 1, 1], [], []>} : vector<32x5xbf16>, vector<5x256xbf16>, vector<32x256xf32> -> vector<32x256xf32>
    %29 = arith.addf %22, %28 : vector<32x256xf32>
    %c0_27 = arith.constant 0 : index
    %c127 = arith.constant 127 : index
    %30 = vector.load %arg9[%c0_27, %c127] : memref<5x512xbf16, #tpu.memory_space<vmem>>, vector<5x256xbf16>
    %31 = vector.broadcast %0 : vector<1x256xbf16> to vector<5x256xbf16>
    %32 = arith.mulf %30, %31 : vector<5x256xbf16>
    %c3 = arith.constant 3 : index
    %c0_28 = arith.constant 0 : index
    %c0_29 = arith.constant 0 : index
    %33 = vector.load %arg4[%c3, %c0_28, %c0_29] : memref<9x32x5xbf16, #tpu.memory_space<vmem>>, vector<1x32x5xbf16>
    %34 = vector.shape_cast %33 : vector<1x32x5xbf16> to vector<32x5xbf16>
    %cst_30 = arith.constant dense<0.000000e+00> : vector<32x256xf32>
    %35 = tpu.matmul %34, %32, %cst_30 {dimension_numbers = #tpu.dot_dimension_numbers<[1], [0], [0], [1], [0, 0, 1, 1], [], []>} : vector<32x5xbf16>, vector<5x256xbf16>, vector<32x256xf32> -> vector<32x256xf32>
    %36 = arith.addf %29, %35 : vector<32x256xf32>
    %c0_31 = arith.constant 0 : index
    %c128_32 = arith.constant 128 : index
    %37 = vector.load %arg9[%c0_31, %c128_32] : memref<5x512xbf16, #tpu.memory_space<vmem>>, vector<5x256xbf16>
    %c4_33 = arith.constant 4 : index
    %c0_34 = arith.constant 0 : index
    %c0_35 = arith.constant 0 : index
    %38 = vector.load %arg4[%c4_33, %c0_34, %c0_35] : memref<9x32x5xbf16, #tpu.memory_space<vmem>>, vector<1x32x5xbf16>
    %39 = vector.shape_cast %38 : vector<1x32x5xbf16> to vector<32x5xbf16>
    %cst_36 = arith.constant dense<0.000000e+00> : vector<32x256xf32>
    %40 = tpu.matmul %39, %37, %cst_36 {dimension_numbers = #tpu.dot_dimension_numbers<[1], [0], [0], [1], [0, 0, 1, 1], [], []>} : vector<32x5xbf16>, vector<5x256xbf16>, vector<32x256xf32> -> vector<32x256xf32>
    %41 = arith.addf %36, %40 : vector<32x256xf32>
    %c0_37 = arith.constant 0 : index
    %c129 = arith.constant 129 : index
    %42 = vector.load %arg9[%c0_37, %c129] : memref<5x512xbf16, #tpu.memory_space<vmem>>, vector<5x256xbf16>
    %43 = vector.broadcast %1 : vector<1x256xbf16> to vector<5x256xbf16>
    %44 = arith.mulf %42, %43 : vector<5x256xbf16>
    %c5 = arith.constant 5 : index
    %c0_38 = arith.constant 0 : index
    %c0_39 = arith.constant 0 : index
    %45 = vector.load %arg4[%c5, %c0_38, %c0_39] : memref<9x32x5xbf16, #tpu.memory_space<vmem>>, vector<1x32x5xbf16>
    %46 = vector.shape_cast %45 : vector<1x32x5xbf16> to vector<32x5xbf16>
    %cst_40 = arith.constant dense<0.000000e+00> : vector<32x256xf32>
    %47 = tpu.matmul %46, %44, %cst_40 {dimension_numbers = #tpu.dot_dimension_numbers<[1], [0], [0], [1], [0, 0, 1, 1], [], []>} : vector<32x5xbf16>, vector<5x256xbf16>, vector<32x256xf32> -> vector<32x256xf32>
    %48 = arith.addf %41, %47 : vector<32x256xf32>
    %c0_41 = arith.constant 0 : index
    %c143 = arith.constant 143 : index
    %49 = vector.load %arg9[%c0_41, %c143] : memref<5x512xbf16, #tpu.memory_space<vmem>>, vector<5x256xbf16>
    %50 = vector.broadcast %0 : vector<1x256xbf16> to vector<5x256xbf16>
    %51 = arith.mulf %49, %50 : vector<5x256xbf16>
    %c6 = arith.constant 6 : index
    %c0_42 = arith.constant 0 : index
    %c0_43 = arith.constant 0 : index
    %52 = vector.load %arg4[%c6, %c0_42, %c0_43] : memref<9x32x5xbf16, #tpu.memory_space<vmem>>, vector<1x32x5xbf16>
    %53 = vector.shape_cast %52 : vector<1x32x5xbf16> to vector<32x5xbf16>
    %cst_44 = arith.constant dense<0.000000e+00> : vector<32x256xf32>
    %54 = tpu.matmul %53, %51, %cst_44 {dimension_numbers = #tpu.dot_dimension_numbers<[1], [0], [0], [1], [0, 0, 1, 1], [], []>} : vector<32x5xbf16>, vector<5x256xbf16>, vector<32x256xf32> -> vector<32x256xf32>
    %55 = arith.addf %48, %54 : vector<32x256xf32>
    %c0_45 = arith.constant 0 : index
    %c144 = arith.constant 144 : index
    %56 = vector.load %arg9[%c0_45, %c144] : memref<5x512xbf16, #tpu.memory_space<vmem>>, vector<5x256xbf16>
    %c7 = arith.constant 7 : index
    %c0_46 = arith.constant 0 : index
    %c0_47 = arith.constant 0 : index
    %57 = vector.load %arg4[%c7, %c0_46, %c0_47] : memref<9x32x5xbf16, #tpu.memory_space<vmem>>, vector<1x32x5xbf16>
    %58 = vector.shape_cast %57 : vector<1x32x5xbf16> to vector<32x5xbf16>
    %cst_48 = arith.constant dense<0.000000e+00> : vector<32x256xf32>
    %59 = tpu.matmul %58, %56, %cst_48 {dimension_numbers = #tpu.dot_dimension_numbers<[1], [0], [0], [1], [0, 0, 1, 1], [], []>} : vector<32x5xbf16>, vector<5x256xbf16>, vector<32x256xf32> -> vector<32x256xf32>
    %60 = arith.addf %55, %59 : vector<32x256xf32>
    %c0_49 = arith.constant 0 : index
    %c145 = arith.constant 145 : index
    %61 = vector.load %arg9[%c0_49, %c145] : memref<5x512xbf16, #tpu.memory_space<vmem>>, vector<5x256xbf16>
    %62 = vector.broadcast %1 : vector<1x256xbf16> to vector<5x256xbf16>
    %63 = arith.mulf %61, %62 : vector<5x256xbf16>
    %c8 = arith.constant 8 : index
    %c0_50 = arith.constant 0 : index
    %c0_51 = arith.constant 0 : index
    %64 = vector.load %arg4[%c8, %c0_50, %c0_51] : memref<9x32x5xbf16, #tpu.memory_space<vmem>>, vector<1x32x5xbf16>
    %65 = vector.shape_cast %64 : vector<1x32x5xbf16> to vector<32x5xbf16>
    %cst_52 = arith.constant dense<0.000000e+00> : vector<32x256xf32>
    %66 = tpu.matmul %65, %63, %cst_52 {dimension_numbers = #tpu.dot_dimension_numbers<[1], [0], [0], [1], [0, 0, 1, 1], [], []>} : vector<32x5xbf16>, vector<5x256xbf16>, vector<32x256xf32> -> vector<32x256xf32>
    %67 = arith.addf %60, %66 : vector<32x256xf32>
    %c0_53 = arith.constant 0 : index
    %c0_54 = arith.constant 0 : index
    %c0_55 = arith.constant 0 : index
    %68 = vector.load %arg5[%c0_53, %c0_54, %c0_55] : memref<1x32x1xf32, #tpu.memory_space<vmem>>, vector<1x32x1xf32>
    %69 = vector.shape_cast %68 : vector<1x32x1xf32> to vector<32x1xf32>
    %70 = vector.broadcast %69 : vector<32x1xf32> to vector<32x256xf32>
    %71 = arith.addf %67, %70 : vector<32x256xf32>
    %cst_56 = arith.constant 0.000000e+00 : f32
    %72 = vector.broadcast %cst_56 : f32 to vector<32x256xf32>
    %73 = arith.subf %72, %71 : vector<32x256xf32>
    %74 = math.exp %73 : vector<32x256xf32>
    %cst_57 = arith.constant 1.000000e+00 : f32
    %75 = vector.broadcast %cst_57 : f32 to vector<32x256xf32>
    %76 = arith.addf %75, %74 : vector<32x256xf32>
    %77 = tpu.reciprocal %76 {approx = true} : vector<32x256xf32> -> vector<32x256xf32>
    %78 = arith.mulf %71, %77 : vector<32x256xf32>
    %79 = arith.truncf %78 : vector<32x256xf32> to vector<32x256xbf16>
    %cst_58 = arith.constant 0.000000e+00 : bf16
    %80 = vector.broadcast %cst_58 : bf16 to vector<32x128xbf16>
    %c0_59 = arith.constant 0 : index
    %c0_60 = arith.constant 0 : index
    %81 = vector.load %arg10[%c0_59, %c0_60] : memref<32x512xbf16, #tpu.memory_space<vmem>>, vector<32x128xbf16>
    tpu.vector_store %arg10[%c0_59, %c0_60], %80 {strides = array<i32>} : memref<32x512xbf16, #tpu.memory_space<vmem>>, vector<32x128xbf16>,
    %cst_61 = arith.constant 0.000000e+00 : bf16
    %82 = vector.broadcast %cst_61 : bf16 to vector<32x128xbf16>
    %c0_62 = arith.constant 0 : index
    %c384_63 = arith.constant 384 : index
    %83 = vector.load %arg10[%c0_62, %c384_63] : memref<32x512xbf16, #tpu.memory_space<vmem>>, vector<32x128xbf16>
    tpu.vector_store %arg10[%c0_62, %c384_63], %82 {strides = array<i32>} : memref<32x512xbf16, #tpu.memory_space<vmem>>, vector<32x128xbf16>,
    %c0_64 = arith.constant 0 : index
    %c128_65 = arith.constant 128 : index
    %84 = vector.load %arg10[%c0_64, %c128_65] : memref<32x512xbf16, #tpu.memory_space<vmem>>, vector<32x256xbf16>
    tpu.vector_store %arg10[%c0_64, %c128_65], %79 {strides = array<i32>} : memref<32x512xbf16, #tpu.memory_space<vmem>>, vector<32x256xbf16>,
    %c0_66 = arith.constant 0 : index
    %c111_67 = arith.constant 111 : index
    %85 = vector.load %arg10[%c0_66, %c111_67] : memref<32x512xbf16, #tpu.memory_space<vmem>>, vector<32x256xbf16>
    %86 = vector.broadcast %0 : vector<1x256xbf16> to vector<32x256xbf16>
    %87 = arith.mulf %85, %86 : vector<32x256xbf16>
    %c0_68 = arith.constant 0 : index
    %c0_69 = arith.constant 0 : index
    %c0_70 = arith.constant 0 : index
    %88 = vector.load %arg6[%c0_68, %c0_69, %c0_70] : memref<9x4x32xbf16, #tpu.memory_space<vmem>>, vector<1x4x32xbf16>
    %89 = vector.shape_cast %88 : vector<1x4x32xbf16> to vector<4x32xbf16>
    %cst_71 = arith.constant dense<0.000000e+00> : vector<4x256xf32>
    %90 = tpu.matmul %89, %87, %cst_71 {dimension_numbers = #tpu.dot_dimension_numbers<[1], [0], [0], [1], [0, 0, 1, 1], [], []>} : vector<4x32xbf16>, vector<32x256xbf16>, vector<4x256xf32> -> vector<4x256xf32>
    %c0_72 = arith.constant 0 : index
    %c112_73 = arith.constant 112 : index
    %91 = vector.load %arg10[%c0_72, %c112_73] : memref<32x512xbf16, #tpu.memory_space<vmem>>, vector<32x256xbf16>
    %c1_74 = arith.constant 1 : index
    %c0_75 = arith.constant 0 : index
    %c0_76 = arith.constant 0 : index
    %92 = vector.load %arg6[%c1_74, %c0_75, %c0_76] : memref<9x4x32xbf16, #tpu.memory_space<vmem>>, vector<1x4x32xbf16>
    %93 = vector.shape_cast %92 : vector<1x4x32xbf16> to vector<4x32xbf16>
    %cst_77 = arith.constant dense<0.000000e+00> : vector<4x256xf32>
    %94 = tpu.matmul %93, %91, %cst_77 {dimension_numbers = #tpu.dot_dimension_numbers<[1], [0], [0], [1], [0, 0, 1, 1], [], []>} : vector<4x32xbf16>, vector<32x256xbf16>, vector<4x256xf32> -> vector<4x256xf32>
    %95 = arith.addf %90, %94 : vector<4x256xf32>
    %c0_78 = arith.constant 0 : index
    %c113_79 = arith.constant 113 : index
    %96 = vector.load %arg10[%c0_78, %c113_79] : memref<32x512xbf16, #tpu.memory_space<vmem>>, vector<32x256xbf16>
    %97 = vector.broadcast %1 : vector<1x256xbf16> to vector<32x256xbf16>
    %98 = arith.mulf %96, %97 : vector<32x256xbf16>
    %c2_80 = arith.constant 2 : index
    %c0_81 = arith.constant 0 : index
    %c0_82 = arith.constant 0 : index
    %99 = vector.load %arg6[%c2_80, %c0_81, %c0_82] : memref<9x4x32xbf16, #tpu.memory_space<vmem>>, vector<1x4x32xbf16>
    %100 = vector.shape_cast %99 : vector<1x4x32xbf16> to vector<4x32xbf16>
    %cst_83 = arith.constant dense<0.000000e+00> : vector<4x256xf32>
    %101 = tpu.matmul %100, %98, %cst_83 {dimension_numbers = #tpu.dot_dimension_numbers<[1], [0], [0], [1], [0, 0, 1, 1], [], []>} : vector<4x32xbf16>, vector<32x256xbf16>, vector<4x256xf32> -> vector<4x256xf32>
    %102 = arith.addf %95, %101 : vector<4x256xf32>
    %c0_84 = arith.constant 0 : index
    %c127_85 = arith.constant 127 : index
    %103 = vector.load %arg10[%c0_84, %c127_85] : memref<32x512xbf16, #tpu.memory_space<vmem>>, vector<32x256xbf16>
    %104 = vector.broadcast %0 : vector<1x256xbf16> to vector<32x256xbf16>
    %105 = arith.mulf %103, %104 : vector<32x256xbf16>
    %c3_86 = arith.constant 3 : index
    %c0_87 = arith.constant 0 : index
    %c0_88 = arith.constant 0 : index
    %106 = vector.load %arg6[%c3_86, %c0_87, %c0_88] : memref<9x4x32xbf16, #tpu.memory_space<vmem>>, vector<1x4x32xbf16>
    %107 = vector.shape_cast %106 : vector<1x4x32xbf16> to vector<4x32xbf16>
    %cst_89 = arith.constant dense<0.000000e+00> : vector<4x256xf32>
    %108 = tpu.matmul %107, %105, %cst_89 {dimension_numbers = #tpu.dot_dimension_numbers<[1], [0], [0], [1], [0, 0, 1, 1], [], []>} : vector<4x32xbf16>, vector<32x256xbf16>, vector<4x256xf32> -> vector<4x256xf32>
    %109 = arith.addf %102, %108 : vector<4x256xf32>
    %c0_90 = arith.constant 0 : index
    %c128_91 = arith.constant 128 : index
    %110 = vector.load %arg10[%c0_90, %c128_91] : memref<32x512xbf16, #tpu.memory_space<vmem>>, vector<32x256xbf16>
    %c4_92 = arith.constant 4 : index
    %c0_93 = arith.constant 0 : index
    %c0_94 = arith.constant 0 : index
    %111 = vector.load %arg6[%c4_92, %c0_93, %c0_94] : memref<9x4x32xbf16, #tpu.memory_space<vmem>>, vector<1x4x32xbf16>
    %112 = vector.shape_cast %111 : vector<1x4x32xbf16> to vector<4x32xbf16>
    %cst_95 = arith.constant dense<0.000000e+00> : vector<4x256xf32>
    %113 = tpu.matmul %112, %110, %cst_95 {dimension_numbers = #tpu.dot_dimension_numbers<[1], [0], [0], [1], [0, 0, 1, 1], [], []>} : vector<4x32xbf16>, vector<32x256xbf16>, vector<4x256xf32> -> vector<4x256xf32>
    %114 = arith.addf %109, %113 : vector<4x256xf32>
    %c0_96 = arith.constant 0 : index
    %c129_97 = arith.constant 129 : index
    %115 = vector.load %arg10[%c0_96, %c129_97] : memref<32x512xbf16, #tpu.memory_space<vmem>>, vector<32x256xbf16>
    %116 = vector.broadcast %1 : vector<1x256xbf16> to vector<32x256xbf16>
    %117 = arith.mulf %115, %116 : vector<32x256xbf16>
    %c5_98 = arith.constant 5 : index
    %c0_99 = arith.constant 0 : index
    %c0_100 = arith.constant 0 : index
    %118 = vector.load %arg6[%c5_98, %c0_99, %c0_100] : memref<9x4x32xbf16, #tpu.memory_space<vmem>>, vector<1x4x32xbf16>
    %119 = vector.shape_cast %118 : vector<1x4x32xbf16> to vector<4x32xbf16>
    %cst_101 = arith.constant dense<0.000000e+00> : vector<4x256xf32>
    %120 = tpu.matmul %119, %117, %cst_101 {dimension_numbers = #tpu.dot_dimension_numbers<[1], [0], [0], [1], [0, 0, 1, 1], [], []>} : vector<4x32xbf16>, vector<32x256xbf16>, vector<4x256xf32> -> vector<4x256xf32>
    %121 = arith.addf %114, %120 : vector<4x256xf32>
    %c0_102 = arith.constant 0 : index
    %c143_103 = arith.constant 143 : index
    %122 = vector.load %arg10[%c0_102, %c143_103] : memref<32x512xbf16, #tpu.memory_space<vmem>>, vector<32x256xbf16>
    %123 = vector.broadcast %0 : vector<1x256xbf16> to vector<32x256xbf16>
    %124 = arith.mulf %122, %123 : vector<32x256xbf16>
    %c6_104 = arith.constant 6 : index
    %c0_105 = arith.constant 0 : index
    %c0_106 = arith.constant 0 : index
    %125 = vector.load %arg6[%c6_104, %c0_105, %c0_106] : memref<9x4x32xbf16, #tpu.memory_space<vmem>>, vector<1x4x32xbf16>
    %126 = vector.shape_cast %125 : vector<1x4x32xbf16> to vector<4x32xbf16>
    %cst_107 = arith.constant dense<0.000000e+00> : vector<4x256xf32>
    %127 = tpu.matmul %126, %124, %cst_107 {dimension_numbers = #tpu.dot_dimension_numbers<[1], [0], [0], [1], [0, 0, 1, 1], [], []>} : vector<4x32xbf16>, vector<32x256xbf16>, vector<4x256xf32> -> vector<4x256xf32>
    %128 = arith.addf %121, %127 : vector<4x256xf32>
    %c0_108 = arith.constant 0 : index
    %c144_109 = arith.constant 144 : index
    %129 = vector.load %arg10[%c0_108, %c144_109] : memref<32x512xbf16, #tpu.memory_space<vmem>>, vector<32x256xbf16>
    %c7_110 = arith.constant 7 : index
    %c0_111 = arith.constant 0 : index
    %c0_112 = arith.constant 0 : index
    %130 = vector.load %arg6[%c7_110, %c0_111, %c0_112] : memref<9x4x32xbf16, #tpu.memory_space<vmem>>, vector<1x4x32xbf16>
    %131 = vector.shape_cast %130 : vector<1x4x32xbf16> to vector<4x32xbf16>
    %cst_113 = arith.constant dense<0.000000e+00> : vector<4x256xf32>
    %132 = tpu.matmul %131, %129, %cst_113 {dimension_numbers = #tpu.dot_dimension_numbers<[1], [0], [0], [1], [0, 0, 1, 1], [], []>} : vector<4x32xbf16>, vector<32x256xbf16>, vector<4x256xf32> -> vector<4x256xf32>
    %133 = arith.addf %128, %132 : vector<4x256xf32>
    %c0_114 = arith.constant 0 : index
    %c145_115 = arith.constant 145 : index
    %134 = vector.load %arg10[%c0_114, %c145_115] : memref<32x512xbf16, #tpu.memory_space<vmem>>, vector<32x256xbf16>
    %135 = vector.broadcast %1 : vector<1x256xbf16> to vector<32x256xbf16>
    %136 = arith.mulf %134, %135 : vector<32x256xbf16>
    %c8_116 = arith.constant 8 : index
    %c0_117 = arith.constant 0 : index
    %c0_118 = arith.constant 0 : index
    %137 = vector.load %arg6[%c8_116, %c0_117, %c0_118] : memref<9x4x32xbf16, #tpu.memory_space<vmem>>, vector<1x4x32xbf16>
    %138 = vector.shape_cast %137 : vector<1x4x32xbf16> to vector<4x32xbf16>
    %cst_119 = arith.constant dense<0.000000e+00> : vector<4x256xf32>
    %139 = tpu.matmul %138, %136, %cst_119 {dimension_numbers = #tpu.dot_dimension_numbers<[1], [0], [0], [1], [0, 0, 1, 1], [], []>} : vector<4x32xbf16>, vector<32x256xbf16>, vector<4x256xf32> -> vector<4x256xf32>
    %140 = arith.addf %133, %139 : vector<4x256xf32>
    %c0_120 = arith.constant 0 : index
    %c0_121 = arith.constant 0 : index
    %c0_122 = arith.constant 0 : index
    %141 = vector.load %arg7[%c0_120, %c0_121, %c0_122] : memref<1x4x1xf32, #tpu.memory_space<vmem>>, vector<1x4x1xf32>
    %142 = vector.shape_cast %141 : vector<1x4x1xf32> to vector<4x1xf32>
    %143 = vector.broadcast %142 : vector<4x1xf32> to vector<4x256xf32>
    %144 = arith.addf %140, %143 : vector<4x256xf32>
    %c0_123 = arith.constant 0 : index
    %c0_124 = arith.constant 0 : index
    %c0_125 = arith.constant 0 : index
    %145 = vector.load %arg8[%c0_123, %c0_124, %c0_125] : memref<1x4x256xf32, #tpu.memory_space<vmem>>, vector<1x4x256xf32>
    %146 = vector.shape_cast %145 : vector<1x4x256xf32> to vector<4x256xf32>
    %147 = vector.shape_cast %144 : vector<4x256xf32> to vector<1x4x256xf32>
    tpu.vector_store %arg8[%c0_123, %c0_124, %c0_125], %147 {strides = array<i32>} : memref<1x4x256xf32, #tpu.memory_space<vmem>>, vector<1x4x256xf32>,
    return
  }
  func.func @transform_0(%arg0: i32) -> (i32, i32, i32) {
    %c0_i32 = arith.constant 0 : i32
    %c0_i32_0 = arith.constant 0 : i32
    %c0_i32_1 = arith.constant 0 : i32
    return %arg0, %c0_i32, %c0_i32_0 : i32, i32, i32
  }
  func.func @transform_1(%arg0: i32) -> (i32, i32) {
    %c0_i32 = arith.constant 0 : i32
    %c0_i32_0 = arith.constant 0 : i32
    %c0_i32_1 = arith.constant 0 : i32
    return %c0_i32, %c0_i32_0 : i32, i32
  }
  func.func @transform_2(%arg0: i32) -> (i32, i32) {
    %c0_i32 = arith.constant 0 : i32
    %c0_i32_0 = arith.constant 0 : i32
    %c0_i32_1 = arith.constant 0 : i32
    return %c0_i32, %c0_i32_0 : i32, i32
  }
  func.func @transform_3(%arg0: i32) -> (i32, i32, i32) {
    %c0_i32 = arith.constant 0 : i32
    %c0_i32_0 = arith.constant 0 : i32
    %c0_i32_1 = arith.constant 0 : i32
    %c0_i32_2 = arith.constant 0 : i32
    return %c0_i32, %c0_i32_0, %c0_i32_1 : i32, i32, i32
  }
  func.func @transform_4(%arg0: i32) -> (i32, i32, i32) {
    %c0_i32 = arith.constant 0 : i32
    %c0_i32_0 = arith.constant 0 : i32
    %c0_i32_1 = arith.constant 0 : i32
    return %arg0, %c0_i32, %c0_i32_0 : i32, i32, i32
  }
  func.func @transform_5(%arg0: i32) -> (i32, i32, i32) {
    %c0_i32 = arith.constant 0 : i32
    %c0_i32_0 = arith.constant 0 : i32
    %c0_i32_1 = arith.constant 0 : i32
    %c0_i32_2 = arith.constant 0 : i32
    return %c0_i32, %c0_i32_0, %c0_i32_1 : i32, i32, i32
  }
  func.func @transform_6(%arg0: i32) -> (i32, i32, i32) {
    %c0_i32 = arith.constant 0 : i32
    %c0_i32_0 = arith.constant 0 : i32
    %c0_i32_1 = arith.constant 0 : i32
    %c0_i32_2 = arith.constant 0 : i32
    return %c0_i32, %c0_i32_0, %c0_i32_1 : i32, i32, i32
  }
  func.func @transform_7(%arg0: i32) -> (i32, i32, i32) {
    %c0_i32 = arith.constant 0 : i32
    %c0_i32_0 = arith.constant 0 : i32
    %c0_i32_1 = arith.constant 0 : i32
    return %arg0, %c0_i32, %c0_i32_0 : i32, i32, i32
  }
}

</mosaic_0001>

<bundles_post_ra>
// kernel: special_score_unet_forward.1
= control target key start
LH: loop header
LB: loop body
LE: loop exit
PB: predicated region body
PF: predicated region fallthrough
CT: control target
= control target key end

     0   :  { %s2644_s24 = smov 0   ;;  %s3147_s0 = inlined_call_operand.vmem [shape: f32[2,4,256], index: 0, kind: input, shape index: {}]   ;;  %s3148_s1 = inlined_call_operand.vmem [shape: bf16[1,256], index: 1, kind: input, shape index: {}]   ;;  %s3149_s2 = inlined_call_operand.vmem [shape: bf16[2,256], index: 2, kind: input, shape index: {}]   ;;  %s3150_s3 = inlined_call_operand.vmem [shape: bf16[9,32,5], index: 3, kind: input, shape index: {}]   ;;  %s3151_s4 = inlined_call_operand.vmem [shape: f32[2,32,1], index: 4, kind: input, shape index: {}]   ;;  %s3152_s5 = inlined_call_operand.vmem [shape: bf16[9,4,32], index: 5, kind: input, shape index: {}]   ;;  %s3153_s6 = inlined_call_operand.vmem [shape: f32[1,4,1], index: 6, kind: input, shape index: {}]   ;;  %s3154_s7 = inlined_call_operand.vmem [shape: f32[2,4,256], index: 7, kind: output, shape index: {}]  }
   0x1 LB: > { %s2297_s25 = sadd.s32 4294967295, %s2590_s24   ;;  %p2301_p0 = scmp.ge.s32.totalorder %s2590_s24, 1  ;;  %s2590_s24 = sphi %s2644_s24, %s17_s24  }
   0x2   : > { %p247_p1 = scmp.lt.s32.totalorder %s2590_s24, 3 }
   0x4   : > { %p248_p2 = pnand %p2301_p0, %p247_p1 }
   0x5   : > { %v329_v0 = vlaneseq (!%p248_p2)  ;;  %v2309_v1 = vld.sshfl [vmem:[%s3149_s2] sm:$0x11 pattern:$0x75316420] (!%p248_p2)  ;;  %vm302_vm0 = vsmask.f32 (!%p248_p2), 2304 }
   0x6   : > { %251 = sbr.rel (%p248_p2) target bundleno = 1079 (0x437), region = 48  ;;  %v2592_v2 = vmov (!%p248_p2), 1935823168   ;;  %vm341_vm1 = vcmask (!%p248_p2), 1042434   ;;  %vm343_vm2 = vcmask (!%p248_p2), 1046534   ;;  %vm301_vm4 = vcmask (!%p248_p2), 1042432  }
   0x7   : > { %v327_v3 = vunpack.c.l.s4 (!%p248_p2), %v2592_v2  ;;  %v330_v4 = vshrl.u32 (!%p248_p2), %v329_v0, 7  ;;  %vm344_vm3 = vsmask.f32 (!%p248_p2), 6400  ;;  %v2593_v5 = vmov (!%p248_p2), 1966171168   ;;  %vm2660_vm5 = vmand (!%p248_p2), %vm301_vm4, %vm302_vm0  ;;  %p284_p3 = scmp.lt.s32.totalorder (!%p248_p2), %s2297_s25, 1 }
   0x8   : > { %v362_v6 = vunpack.c.l.s4 (!%p248_p2), %v2593_v5  ;;  %v304_v7 = vld [vmem:[#allocation2] sm:$0x7] (!%p248_p2)  ;;  %vm2665_vm6 = vmand (!%p248_p2), %vm341_vm1, %vm302_vm0  ;;  %v360_v12 = vcombine.high (!%p248_p2), %v2309_v1, %v2309_v1  ;;  %v347_v17 = vld [vmem:[#allocation2 + $0x4] sm:$0x44] (!%p248_p2)  ;;  %s2594_s11 = smov (!%p248_p2), 113   ;;  %s2595_s12 = smov (!%p248_p2), 1  }
   0x9   : > { %v2525_v8 = vld [vmem:[%s3148_s1] ss:$0 sps:$4 sm:$0x33] (!%p248_p2)   ;;  %v328_v9 = vunpack.c.0.s8 (!%p248_p2), %v327_v3  ;;  %v305_v14 = vsel (!%p248_p2), %vm2660_vm5, 0, %v304_v7  ;;  %vm2672_vm7 = vmand (!%p248_p2), %vm343_vm2, %vm344_vm3  ;;  %v380_v22 = vsub.s32 (!%p248_p2), 0, %v330_v4  ;;  %s2596_s13 = smov (!%p248_p2), 127  }
   0xa   : > { %v363_v13 = vunpack.c.0.s8 (!%p248_p2), %v362_v6  ;;  %306 = vst [vmem:[#allocation2] sm:$0x7] (!%p248_p2), %v305_v14  ;;  %vm346_vm8 = vmor (!%p248_p2), %vm2672_vm7, %vm2665_vm6  ;;  %s2597_s14 = smov (!%p248_p2), 15   ;;  %v307_v40 = vld [vmem:[#allocation2 + $0xc] sm:$0x7] (!%p248_p2)  ;;  %vm623_vm9 = vcmask (!%p248_p2), 924672  }
   0xb   : > { %v331_v15 = vsub.s32 (!%p248_p2), %v328_v9, %v330_v4  ;;  %v308_v41 = vsel (!%p248_p2), %vm2660_vm5, 0, %v307_v40  ;;  %vm739_vm10 = vcmask (!%p248_p2), 1039360   ;;  %v2598_v54 = vmov (!%p248_p2), 0   ;;  %s2599_s15 = smov (!%p248_p2), 111   ;;  %s2600_s16 = smov (!%p248_p2), 17   ;;  %v2532_v40 = vld [vmem:[%s3150_s3 + $0x20] sm:$0xff] (!%p248_p2)  }
   0xc   : > { %v366_v18 = vsub.s32 (!%p248_p2), %v363_v13, %v330_v4  ;;  %309 = vst [vmem:[#allocation2 + $0xc] sm:$0x7] (!%p248_p2), %v308_v41  ;;  %705 = vmatprep.mubr.bf16.mxu0 (!%p248_p2), %v2598_v54  ;;  %488 = vmatprep.mubr.bf16.mxu1 (!%p248_p2), %v2598_v54  ;;  %vm774_vm11 = vcmask (!%p248_p2), 7168   ;;  %vm658_vm12 = vcmask (!%p248_p2), 121856   ;;  %s2601_s17 = smov (!%p248_p2), 16   ;;  %s2602_s18 = smov (!%p248_p2), 112  }
   0xd   : > { %s3162_s25 = smov (!%p284_p3, %s2297_s25), 1  ;;  %v332_v19 = vrot.slane %v2525_v8, %v331_v15  ;;  %2513 = vset.pattern.permute.xlu0 %v2598_v54  ;;  %2514 = vset.pattern.permute.xlu1 %v2598_v54  ;;  %vm446_vm13 = vcmask 1041408   ;;  %vm439_vm14 = vcmask 39936   ;;  %vm397_vm15 = vcmask 908288  }
   0xe   : > { %s2425_s30 = sshll.u32 %s3162_s25, 3  ;;  %v367_v20 = vrot.slane %v2309_v1, %v366_v18  ;;  %v374_v21 = vrot.slane %v360_v12, %v366_v18  ;;  %vm533_vm0 = vcmask 138240   ;;  %vm436_vm1 = vcmask 130048   ;;  %s2426_s27 = sshll.u32 %s3162_s25, 5 }
   0xf   : > { %s288_s10 = scalar_lea.vmem %s3147_s0, %s2425_s30  ;;  %v339_v23 = vrot.slane %v332_v19, %v331_v15  ;;  %s293_s8 = scalar_lea.vmem %s3151_s4, %s2426_s27  ;;  %vm1199_vm2 = vcmask 916480   ;;  %vm1528_vm3 = vcmask 261120  }
  0x10   : > { %v310_v24 = vld [vmem:[%s288_s10] sm:$0xff]  ;;  %v601_v25 = vshrl.u32 %v367_v20, 16  ;;  %v608_v26 = vshrl.u32 %v374_v21, 16  ;;  %v376_v27 = vpack.i.b16 %v367_v20, %v367_v20  ;;  %v383_v28 = vpack.i.b16 %v374_v21, %v374_v21 }
  0x11   : > { %v348_v29 = vsel %vm346_vm8, %v339_v23, %v347_v17  ;;  %v312_v30 = vcombine.high %v310_v24, %v310_v24  ;;  %v2603_v23 = vmov 65535  }
  0x12   : > { %349 = vst [vmem:[#allocation2 + $0x4] sm:$0x44] %v348_v29  ;;  %v602_v31 = vpack.i.b16 %v601_v25, %v601_v25  ;;  %v609_v32 = vpack.i.b16 %v608_v26, %v608_v26  ;;  %v2692_v36 = vrot.slane %v376_v27, %v380_v22  ;;  %v2694_v37 = vrot.slane %v383_v28, %v380_v22 }
  0x13   : > { %v2428_v33 = vpack.c.bf16 %v312_v30, %v310_v24  ;;  %v2722_v1 = vld [vmem:[#allocation2 + $0xc] sm:$0x7]  ;;  %v448_v24 = vsel %vm446_vm13, 4294967295, %v2603_v23 }
  0x14   : > { %v2688_v34 = vrot.slane %v602_v31, %v380_v22  ;;  %v2690_v35 = vrot.slane %v609_v32, %v380_v22  ;;  %v2310_v39 = vcombine.low %v2692_v36, %v2694_v37  ;;  %v2392_v20 = vcombine.low %v2722_v1, %v2722_v1 }
  0x15   : > { %322 = vst [vmem:[#allocation2 + $0x4] sm:$0x33] %v2428_v33  ;;  %v2761_v25 = vsel %vm301_vm4, %v448_v24, 0 }
  0x16   : > { %v2329_v38 = vcombine.low %v2688_v34, %v2690_v35 }
  0x18   : > { %620 = vrot.lane.b32.xlu0 %v2329_v38, %s2594_s11  ;;  %946 = vrot.lane.b32.xlu1 %v2329_v38, %s2595_s12 }
  0x1c   : > { %736 = vrot.lane.b32.xlu0 %v2310_v39, %s2596_s13  ;;  %1058 = vrot.lane.b32.xlu1 %v2310_v39, %s2597_s14  ;;  %v2706_v43 = vld [vmem:[#allocation2 + $0x8] sm:$0x7]  ;;  %v2708_v44 = vld [vmem:[#allocation2] sm:$0x77] }
  0x1d   : > { %v734_v50 = vld [vmem:[#allocation2] sm:$0x77]  ;;  %v735_v51 = vld [vmem:[#allocation2 + $0x8] sm:$0x7]  ;;  %v2318_v17 = vcombine.high %v2708_v44, %v2708_v44  ;;  %v2319_v18 = vcombine.low %v2706_v43, %v2706_v43  ;;  %v2317_v21 = vcombine.low %v2708_v44, %v2708_v44 }
  0x1e   : > { %v2724_v2 = vld [vmem:[#allocation2 + $0x4] sm:$0x77] }
  0x1f   : > { %v2391_v19 = vcombine.high %v2724_v2, %v2724_v2  ;;  %v2390_v22 = vcombine.low %v2724_v2, %v2724_v2  ;;  %v850_v30 = vld [vmem:[#allocation2 + $0x4] sm:$0x77] }
  0x8a   : > { %v621_v42 = vpop.permute.xlu0 %620  ;;  %v947_v56 = vpop.permute.xlu1 %946 }
  0x8b   : > { %v622_v45 = vrot.slane %v621_v42, 4  ;;  %v948_v60 = vrot.slane %v947_v56, 4 }
  0x8d   : > { %v624_v46 = vsel %vm623_vm9, %v622_v45, %v621_v42  ;;  %v628_v47 = vmul.bf16 %v622_v45, %v2706_v43  ;;  %v949_v3 = vsel %vm774_vm11, %v948_v60, %v947_v56  ;;  %v953_v7 = vmul.bf16 %v948_v60, %v2722_v1 }
  0x8e   : > { %v627_v48 = vmul.bf16 %v624_v46, %v2708_v44  ;;  %v737_v49 = vpop.permute.xlu0 %736  ;;  %v1059_v63 = vpop.permute.xlu1 %1058  ;;  %v952_v6 = vmul.bf16 %v949_v3, %v2724_v2 }
  0x8f   : > { %v738_v52 = vrot.slane %v737_v49, 4  ;;  %v2338_v53 = vcombine.low %v628_v47, %v628_v47  ;;  %v1060_v4 = vrot.slane %v1059_v63, 4  ;;  %v2370_v10 = vcombine.low %v953_v7, %v953_v7 }
  0x90   : > { %v2337_v55 = vcombine.high %v627_v48, %v627_v48  ;;  %v2336_v62 = vcombine.low %v627_v48, %v627_v48  ;;  %v2369_v9 = vcombine.high %v952_v6, %v952_v6  ;;  %v2368_v12 = vcombine.low %v952_v6, %v952_v6 }
  0x91   : > { %v740_v57 = vsel %vm739_vm10, %v738_v52, %v737_v49  ;;  %656 = vrot.lane.b32.xlu1 %v2338_v53, %s2597_s14  ;;  %v744_v59 = vmul.bf16 %v738_v52, %v735_v51  ;;  %v1061_v8 = vsel %vm658_vm12, %v1060_v4, %v1059_v63  ;;  %v1065_v13 = vmul.bf16 %v1060_v4, %v2722_v1 }
  0x92   : > { %v743_v58 = vmul.bf16 %v740_v57, %v734_v50  ;;  %654 = vrot.lane.b32.xlu0 %v2337_v55, %s2597_s14  ;;  %v1064_v11 = vmul.bf16 %v1061_v8, %v2724_v2 }
  0x93   : > { %v2349_v0 = vcombine.low %v744_v59, %v744_v59  ;;  %v2381_v15 = vcombine.low %v1065_v13, %v1065_v13  ;;  %v2533_v59 = vld [vmem:[%s3150_s3 + $0x28] sm:$0xff]  }
  0x94   : > { %v2348_v61 = vcombine.high %v743_v58, %v743_v58  ;;  %v2347_v5 = vcombine.low %v743_v58, %v743_v58  ;;  %v2380_v14 = vcombine.high %v1064_v11, %v1064_v11  ;;  %v2379_v16 = vcombine.low %v1064_v11, %v1064_v11 }
  0x96   : > { %770 = vrot.lane.b32.xlu1 %v2348_v61, %s2595_s12  ;;  %652 = vrot.lane.b32.xlu0 %v2336_v62, %s2597_s14 }
  0x9a   : > { %768 = vrot.lane.b32.xlu1 %v2347_v5, %s2595_s12  ;;  %772 = vrot.lane.b32.xlu0 %v2349_v0, %s2595_s12  ;;  %v2358_v5 = vcombine.low %v850_v30, %v850_v30 }
  0x9e   : > { %394 = vrot.lane.b32.xlu0 %v2310_v39, %s2599_s15  ;;  %1275 = vrot.lane.b32.xlu1 %v2329_v38, %s2600_s16  ;;  %v2359_v39 = vcombine.high %v850_v30, %v850_v30  ;;  %v2545_v30 = vld [vmem:[%s3150_s3 + $0x10] sm:$0xff]  }
  0xa0   : > { %v881_v49 = vand.u32 %v2359_v39, %v2761_v25 }
  0xa2   : > { %979 = vrot.lane.b32.xlu0 %v2369_v9, %s2596_s13  ;;  %981 = vrot.lane.b32.xlu1 %v2370_v10, %s2596_s13  ;;  %v878_v10 = vand.u32 %v2358_v5, %v2761_v25 }
  0xa6   : > { %977 = vrot.lane.b32.xlu0 %v2368_v12, %s2596_s13  ;;  %1091 = vrot.lane.b32.xlu1 %v2380_v14, %s2594_s11 }
  0xaa   : > { %1093 = vrot.lane.b32.xlu0 %v2381_v15, %s2594_s11  ;;  %1089 = vrot.lane.b32.xlu1 %v2379_v16, %s2594_s11 }
  0xae   : > { %432 = vrot.lane.b32.xlu0 %v2318_v17, %s2601_s17  ;;  %434 = vrot.lane.b32.xlu1 %v2319_v18, %s2601_s17  ;;  %v2535_v17 = vld [vmem:[%s3150_s3 + $0x38] sm:$0xff]   ;;  %v1387_v18 = vld [vmem:[%s293_s8] sm:$0xff] }
  0xb2   : > { %1195 = vrot.lane.b32.xlu0 %v2391_v19, %s2602_s18  ;;  %1197 = vrot.lane.b32.xlu1 %v2392_v20, %s2602_s18  ;;  %v1388_v19 = vld [vmem:[%s293_s8 + $0x8] sm:$0xff] }
  0xb6   : > { %430 = vrot.lane.b32.xlu0 %v2317_v21, %s2601_s17  ;;  %1193 = vrot.lane.b32.xlu1 %v2390_v22, %s2602_s18  ;;  %v1390_v21 = vld [vmem:[%s293_s8 + $0x18] sm:$0xff]  ;;  %v1389_v22 = vld [vmem:[%s293_s8 + $0x10] sm:$0xff] }
 0x103   : > { %v657_v26 = vpop.permute.xlu1 %656 }
 0x104   : > { %v655_v27 = vpop.permute.xlu0 %654 }
 0x105   : > { %v660_v28 = vsel %vm658_vm12, %v655_v27, %v657_v26 }
 0x106   : > { %v671_v29 = vand.u32 %v660_v28, %v2761_v25 }
 0x108   : > { %v771_v31 = vpop.permute.xlu1 %770  ;;  %673 = vmatprep.subr.bf16.mxu0 %v671_v29  ;;  %v653_v32 = vpop.permute.xlu0 %652  ;;  %v2538_v29 = vld [vmem:[%s3150_s3 + $0x40] sm:$0xff]  }
 0x109   : > { %v659_v33 = vsel %vm658_vm12, %v653_v32, %v655_v27 }
 0x10a   : > { %v668_v38 = vand.u32 %v659_v33, %v2761_v25  ;;  %v2539_v33 = vld [vmem:[%s3150_s3 + $0x48] sm:$0xff]  }
 0x10c   : > { %v769_v41 = vpop.permute.xlu1 %768  ;;  %674 = vmatpush1.bf16.msra.mxu0 %v668_v38  ;;  %v773_v42 = vpop.permute.xlu0 %772  ;;  %v2547_v38 = vld [vmem:[%s3150_s3 + $0x18] sm:$0xff]  }
 0x10d   : > { %v775_v45 = vsel %vm774_vm11, %v769_v41, %v771_v31  ;;  %v776_v46 = vsel %vm774_vm11, %v771_v31, %v773_v42  ;;  %v2540_v42 = vld [vmem:[%s3150_s3 + $0x50] sm:$0xff]  }
 0x10e   : > { %v784_v47 = vand.u32 %v775_v45, %v2761_v25  ;;  %v787_v48 = vand.u32 %v776_v46, %v2761_v25 }
 0x10f   : > { %2339 = vmatmul.mubr.msk.bf16.vlgmr.msra.gmra.mrb[0].mxu0 %vm439_vm14, %v2532_v40 }
 0x110   : > { %789 = vmatprep.subr.bf16.mxu0 %v787_v48  ;;  %v395_v50 = vpop.permute.xlu0 %394  ;;  %v1276_v51 = vpop.permute.xlu1 %1275  ;;  %715 = vmatprep.mubr.bf16.mxu0 %v2598_v54  ;;  %v2542_v48 = vld [vmem:[%s3150_s3 + $0x60] sm:$0xff]  }
 0x111   : > { %v396_v52 = vrot.slane %v395_v50, 4  ;;  %790 = vmatpush1.bf16.msra.mxu0 %v784_v47  ;;  %v1277_v53 = vrot.slane %v1276_v51, 4  ;;  %v2541_v47 = vld [vmem:[%s3150_s3 + $0x58] sm:$0xff]  }
 0x112   : > { %883 = vmatprep.subr.bf16.mxu0 %v881_v49  ;;  %v2544_v49 = vld [vmem:[%s3150_s3 + $0x70] sm:$0xff]  }
 0x113   : > { %v398_v55 = vsel %vm397_vm15, %v396_v52, %v395_v50  ;;  %v402_v56 = vmul.bf16 %v396_v52, %v2706_v43  ;;  %v1278_v57 = vsel %vm533_vm0, %v1277_v53, %v1276_v51  ;;  %v1282_v58 = vmul.bf16 %v1277_v53, %v2722_v1  ;;  %v2546_v50 = vld [vmem:[%s3150_s3 + $0x78] sm:$0xff]  }
 0x114   : > { %v401_v60 = vmul.bf16 %v398_v55, %v2708_v44  ;;  %v980_v61 = vpop.permute.xlu0 %979  ;;  %v982_v62 = vpop.permute.xlu1 %981  ;;  %v1281_v0 = vmul.bf16 %v1278_v57, %v2724_v2  ;;  %v2534_v2 = vld [vmem:[%s3150_s3 + $0x30] sm:$0xff]  }
 0x115   : > { %v2326_v63 = vcombine.low %v402_v56, %v402_v56  ;;  %v2403_v4 = vcombine.low %v1282_v58, %v1282_v58  ;;  %v984_v6 = vsel %vm739_vm10, %v980_v61, %v982_v62 }
 0x116   : > { %v2325_v3 = vcombine.high %v401_v60, %v401_v60  ;;  %v2402_v44 = vcombine.high %v1281_v0, %v1281_v0  ;;  %v2401_v9 = vcombine.low %v1281_v0, %v1281_v0  ;;  %v2324_v11 = vcombine.low %v401_v60, %v401_v60 }
 0x117   : > { %531 = vrot.lane.b32.xlu1 %v2326_v63, %s2600_s16  ;;  %2340 = vmatmul.mubr.msk.bf16.gmra.mrb[4].mxu0 %vm439_vm14, %v2533_v59  ;;  %v995_v12 = vand.u32 %v984_v6, %v2761_v25 }
 0x118   : > { %529 = vrot.lane.b32.xlu0 %v2325_v3, %s2600_s16  ;;  %821 = vmatprep.mubr.bf16.mxu0 %v2598_v54  ;;  %v978_v43 = vpop.permute.xlu0 %977  ;;  %v2790_v1 = vpop.permute.xlu1 %1091 }
 0x119   : > { %v983_v24 = vsel %vm739_vm10, %v978_v43, %v980_v61  ;;  %v2549_v43 = vld [vmem:[%s3150_s3] sm:$0xff]  }
 0x11a   : > { %v992_v31 = vand.u32 %v983_v24, %v2761_v25 }
 0x11b   : > { %1310 = vrot.lane.b32.xlu1 %v2403_v4, %s2599_s15  ;;  %v2548_v4 = vld [vmem:[%s3150_s3 + $0x80] sm:$0xff]  }
 0x11c   : > { %1308 = vrot.lane.b32.xlu0 %v2402_v44, %s2599_s15  ;;  %v1094_v7 = vpop.permute.xlu0 %1093  ;;  %v1090_v8 = vpop.permute.xlu1 %1089 }
 0x11d   : > { %v1096_v27 = vsel %vm623_vm9, %v2790_v1, %v1094_v7  ;;  %v1095_v39 = vsel %vm623_vm9, %v1090_v8, %v2790_v1  ;;  %v2551_v1 = vld [vmem:[%s3150_s3 + $0x8] sm:$0xff]  }
 0x11e   : > { %v1107_v32 = vand.u32 %v1096_v27, %v2761_v25  ;;  %v1104_v45 = vand.u32 %v1095_v39, %v2761_v25 }
 0x11f   : > { %1306 = vrot.lane.b32.xlu1 %v2401_v9, %s2599_s15  ;;  %2350 = vmatmul.mubr.msk.bf16.vlgmr.msra.gmra.mrb[0].mxu0 %vm439_vm14, %v2534_v2 }
 0x120   : > { %527 = vrot.lane.b32.xlu0 %v2324_v11, %s2600_s16  ;;  %831 = vmatprep.mubr.bf16.mxu0 %v2598_v54  ;;  %v433_v13 = vpop.permute.xlu0 %432  ;;  %v435_v14 = vpop.permute.xlu1 %434 }
 0x121   : > { %884 = vmatpush1.bf16.msra.mxu0 %v878_v10  ;;  %v438_v15 = vsel %vm436_vm1, %v433_v13, %v435_v14 }
 0x122   : > { %997 = vmatprep.subr.bf16.mxu0 %v995_v12  ;;  %v454_v16 = vand.u32 %v2761_v25, %v438_v15 }
 0x123   : > { %1398 = vperm.xlu1 %2514, %v1388_v19  }
 0x124   : > { %v1196_v20 = vpop.permute.xlu0 %1195  ;;  %456 = vmatprep.subr.bf16.mxu1 %v454_v16  ;;  %1393 = vperm.xlu0 %2513, %v1387_v18   ;;  %v1198_v40 = vpop.permute.xlu1 %1197 }
 0x125   : > { %v1201_v41 = vsel %vm1199_vm2, %v1196_v20, %v1198_v40 }
 0x126   : > { %v1212_v46 = vand.u32 %v1201_v41, %v2761_v25 }
 0x127   : > { %2351 = vmatmul.mubr.msk.bf16.gmra.mrb[4].mxu0 %vm439_vm14, %v2535_v17  ;;  %1403 = vperm.xlu1 %2514, %v1389_v22  }
 0x128   : > { %915 = vmatprep.mubr.bf16.mxu0 %v2598_v54  ;;  %v431_v23 = vpop.permute.xlu0 %430  ;;  %1408 = vperm.xlu0 %2513, %v1390_v21  }
 0x129   : > { %v437_v26 = vsel %vm436_vm1, %v431_v23, %v433_v13 }
 0x12a   : > { %v451_v28 = vand.u32 %v2761_v25, %v437_v26 }
 0x12b   : > { %1485 = vrot.lane.b32.xlu1 %v2692_v36, %s2599_s15 }
 0x12c   : > { %457 = vmatpush1.bf16.msra.mxu1 %v451_v28  ;;  %1487 = vrot.lane.b32.xlu0 %v2694_v37, %s2599_s15 }
 0x12f   : > { %2360 = vmatmul.mubr.msk.bf16.vlgmr.msra.gmra.mrb[0].mxu0 %vm439_vm14, %v2538_v29  ;;  %2320 = vmatmul.mubr.msk.bf16.vlgmr.msra.gmra.mrb[0].mxu1 %vm439_vm14, %v2545_v30 }
 0x130   : > { %925 = vmatprep.mubr.bf16.mxu0 %v2598_v54  ;;  %998 = vmatpush1.bf16.msra.mxu0 %v992_v31 }
 0x131   : > { %1109 = vmatprep.subr.bf16.mxu0 %v1107_v32  ;;  %498 = vmatprep.mubr.bf16.mxu1 %v2598_v54 }
 0x132   : > { %1643 = vrot.lane.b32.xlu1 %v2688_v34, %s2594_s11  ;;  %1645 = vrot.lane.b32.xlu0 %v2690_v35, %s2594_s11 }
 0x136   : > { %1737 = vrot.lane.b32.xlu1 %v2692_v36, %s2596_s13  ;;  %1739 = vrot.lane.b32.xlu0 %v2694_v37, %s2596_s13 }
 0x137   : > { %2361 = vmatmul.mubr.msk.bf16.gmra.mrb[4].mxu0 %vm439_vm14, %v2539_v33  ;;  %2321 = vmatmul.mubr.msk.bf16.gmra.mrb[4].mxu1 %vm439_vm14, %v2547_v38 }
 0x138   : > { %1029 = vmatprep.mubr.bf16.mxu0 %v2598_v54  ;;  %580 = vmatprep.mubr.bf16.mxu1 %v2598_v54 }
 0x13a   : > { %1879 = vrot.lane.b32.xlu1 %v2688_v34, %s2595_s12  ;;  %1881 = vrot.lane.b32.xlu0 %v2690_v35, %s2595_s12 }
 0x13e   : > { %1967 = vrot.lane.b32.xlu1 %v2692_v36, %s2597_s14  ;;  %1969 = vrot.lane.b32.xlu0 %v2694_v37, %s2597_s14  ;;  %v1194_v36 = vpop.permute.xlu1 %1193 }
 0x13f   : > { %2371 = vmatmul.mubr.msk.bf16.vlgmr.msra.gmra.mrb[0].mxu0 %vm439_vm14, %v2540_v42  ;;  %v1200_v37 = vsel %vm1199_vm2, %v1194_v36, %v1196_v20 }
 0x140   : > { %1039 = vmatprep.mubr.bf16.mxu0 %v2598_v54  ;;  %1110 = vmatpush1.bf16.msra.mxu0 %v1104_v45 }
 0x141   : > { %1214 = vmatprep.subr.bf16.mxu0 %v1212_v46 }
 0x142   : > { %2516 = vrot.lane.b32.xlu1 %v2598_v54, %s2601_s17  ;;  %2129 = vrot.lane.b32.xlu0 %v2688_v34, %s2600_s16  ;;  %v1209_v34 = vand.u32 %v1200_v37, %v2761_v25 }
 0x146   : > { %2131 = vrot.lane.b32.xlu1 %v2690_v35, %s2600_s16  ;;  %v2543_v35 = vld [vmem:[%s3150_s3 + $0x68] sm:$0xff]  }
 0x147   : > { %2372 = vmatmul.mubr.msk.bf16.gmra.mrb[4].mxu0 %vm439_vm14, %v2541_v47 }
 0x148   : > { %1141 = vmatprep.mubr.bf16.mxu0 %v2598_v54 }
 0x14f   : > { %2382 = vmatmul.mubr.msk.bf16.vlgmr.msra.gmra.mrb[0].mxu0 %vm439_vm14, %v2542_v48 }
 0x150   : > { %1151 = vmatprep.mubr.bf16.mxu0 %v2598_v54  ;;  %1215 = vmatpush1.bf16.msra.mxu0 %v1209_v34 }
 0x157   : > { %2383 = vmatmul.mubr.msk.bf16.gmra.mrb[4].mxu0 %vm439_vm14, %v2543_v35 }
 0x158   : > { %1246 = vmatprep.mubr.bf16.mxu0 %v2598_v54 }
 0x15f   : > { %2393 = vmatmul.mubr.msk.bf16.vlgmr.msra.gmra.mrb[0].mxu0 %vm439_vm14, %v2544_v49 }
 0x160   : > { %1256 = vmatprep.mubr.bf16.mxu0 %v2598_v54 }
 0x167   : > { %2394 = vmatmul.mubr.msk.bf16.gmra.mrb[4].mxu0 %vm439_vm14, %v2546_v50 }
 0x168   : > { %1358 = vmatprep.mubr.bf16.mxu0 %v2598_v54 }
 0x189   : > { %v532_v51 = vpop.permute.xlu1 %531 }
 0x18a   : > { %v530_v52 = vpop.permute.xlu0 %529 }
 0x18b   : > { %v535_v53 = vsel %vm533_vm0, %v530_v52, %v532_v51 }
 0x18c   : > { %v546_v55 = vand.u32 %v535_v53, %v2761_v25 }
 0x18d   : > { %v1311_v56 = vpop.permute.xlu1 %1310 }
 0x18e   : > { %548 = vmatprep.subr.bf16.mxu1 %v546_v55  ;;  %v1309_v57 = vpop.permute.xlu0 %1308 }
 0x18f   : > { %v1313_v58 = vsel %vm397_vm15, %v1309_v57, %v1311_v56 }
 0x190   : > { %v1324_v59 = vand.u32 %v1313_v58, %v2761_v25 }
 0x191   : > { %v1307_v60 = vpop.permute.xlu1 %1306 }
 0x192   : > { %v1312_v61 = vsel %vm397_vm15, %v1307_v60, %v1309_v57  ;;  %1326 = vmatprep.subr.bf16.mxu0 %v1324_v59  ;;  %v528_v62 = vpop.permute.xlu0 %527 }
 0x193   : > { %v1321_v63 = vand.u32 %v1312_v61, %v2761_v25  ;;  %v534_v0 = vsel %vm533_vm0, %v528_v62, %v530_v52 }
 0x194   : > { %v543_v3 = vand.u32 %v534_v0, %v2761_v25  ;;  %v2550_v25 = vld [vmem:[%s3150_s3 + $0x88] sm:$0xff]  }
 0x195   : > { %1327 = vmatpush1.bf16.msra.mxu0 %v1321_v63 }
 0x196   : > { %549 = vmatpush1.bf16.msra.mxu1 %v543_v3 }
 0x198   : > { %2404 = vmatmul.mubr.msk.bf16.vlgmr.msra.gmra.mrb[0].mxu0 %vm439_vm14, %v2548_v4 }
 0x199   : > { %2327 = vmatmul.mubr.msk.bf16.vlgmr.msra.gmra.mrb[0].mxu1 %vm439_vm14, %v2549_v43  ;;  %1368 = vmatprep.mubr.bf16.mxu0 %v2598_v54 }
 0x19a   : > { %590 = vmatprep.mubr.bf16.mxu1 %v2598_v54 }
 0x1a0   : > { %2405 = vmatmul.mubr.msk.bf16.gmra.mrb[4].mxu0 %vm439_vm14, %v2550_v25 }
 0x1a1   : > { %2328 = vmatmul.mubr.msk.bf16.gmra.mrb[4].mxu1 %vm439_vm14, %v2551_v1 }
 0x1a2   : > { %1564 = vmatprep.mubr.bf16.mxu1 %v2598_v54  ;;  %v1399_v5 = vpop.permute.xlu1 %1398 }
 0x1a3   : > { %v1394_v10 = vpop.permute.xlu0 %1393 }
 0x1a6   : > { %v1404_v44 = vpop.permute.xlu1 %1403 }
 0x1a7   : > { %v1409_v51 = vpop.permute.xlu0 %1408 }
 0x1aa   : > { %v2932_v2 = vpop.permute.xlu1 %1485 }
 0x1ab   : > { %v1493_v6 = vmul.bf16 0, %v2932_v2 }
 0x1ad   : > { %1585 = vrot.lane.b32.xlu1 %v1493_v6, %s2600_s16  ;;  %1579 = vrot.lane.b32.xlu0 %v1493_v6, %s2600_s16 }
 0x1ae   : > { %v2937_v7 = vpop.permute.xlu1 %1643 }
 0x1af   : > { %v1651_v8 = vmul.bf16 0, %v2937_v7 }
 0x1b1   : > { %1671 = vrot.lane.b32.xlu1 %v1651_v8, %s2597_s14  ;;  %1665 = vrot.lane.b32.xlu0 %v1651_v8, %s2597_s14 }
 0x26b   : > { %v1360_v9 = vpop.f32.mrb[0].mxu0 }
 0x26c   : > { %v582_v11 = vpop.f32.mrb[0].mxu1  ;;  %v1362_v12 = vpop.f32.mrb[1].mxu0 }
 0x26d   : > { %v2429_v13 = vadd.f32 %v1360_v9, %v582_v11  ;;  %v584_v14 = vpop.f32.mrb[1].mxu1  ;;  %v1364_v15 = vpop.f32.mrb[2].mxu0 }
 0x26e   : > { %v2430_v16 = vadd.f32 %v1362_v12, %v584_v14  ;;  %v586_v17 = vpop.f32.mrb[2].mxu1  ;;  %v1366_v18 = vpop.f32.mrb[3].mxu0 }
 0x26f   : > { %v2431_v19 = vadd.f32 %v1364_v15, %v586_v17  ;;  %v2942_v20 = vadd.f32 %v2429_v13, %v1394_v10  ;;  %v588_v21 = vpop.f32.mrb[3].mxu1 }
 0x270   : > { %v2944_v22 = vadd.f32 %v2430_v16, %v1394_v10  ;;  %v2432_v23 = vadd.f32 %v1366_v18, %v588_v21 }
 0x271   : > { %v1419_v24 = vsub.f32 0.0, %v2942_v20  ;;  %v2947_v26 = vadd.f32 %v2431_v19, %v1399_v5 }
 0x272   : > { %v1420_v27 = vsub.f32 0.0, %v2944_v22  ;;  %v2950_v28 = vadd.f32 %v2432_v23, %v1399_v5 }
 0x273   : > { %v1427_v29 = vmul.f32 1.442695, %v1419_v24  ;;  %v1421_v30 = vsub.f32 0.0, %v2947_v26  ;;  %v1370_v31 = vpop.f32.mrb[4].mxu0 }
 0x274   : > { %v1429_v32 = vmul.f32 1.442695, %v1420_v27  ;;  %v1422_v33 = vsub.f32 0.0, %v2950_v28  ;;  %v592_v38 = vpop.f32.mrb[4].mxu1  ;;  %v1372_v39 = vpop.f32.mrb[5].mxu0 }
 0x275   : > { %2552 = vpow2.f32 %v1427_v29  ;;  %v1431_v40 = vmul.f32 1.442695, %v1421_v30  ;;  %v2433_v41 = vadd.f32 %v1370_v31, %v592_v38  ;;  %v594_v42 = vpop.f32.mrb[5].mxu1  ;;  %v1374_v45 = vpop.f32.mrb[6].mxu0 }
 0x276   : > { %2554 = vpow2.f32 %v1429_v32  ;;  %v1433_v46 = vmul.f32 1.442695, %v1422_v33  ;;  %v2434_v47 = vadd.f32 %v1372_v39, %v594_v42  ;;  %v596_v36 = vpop.f32.mrb[6].mxu1  ;;  %v1376_v37 = vpop.f32.mrb[7].mxu0 }
 0x277   : > { %2556 = vpow2.f32 %v1431_v40  ;;  %v2954_v48 = vadd.f32 %v2433_v41, %v1404_v44  ;;  %v2435_v34 = vadd.f32 %v1374_v45, %v596_v36  ;;  %v598_v35 = vpop.f32.mrb[7].mxu1  ;;  %v1488_v29 = vpop.permute.xlu0 %1487 }
 0x278   : > { %2558 = vpow2.f32 %v1433_v46  ;;  %v2956_v49 = vadd.f32 %v2434_v47, %v1404_v44  ;;  %v2436_v50 = vadd.f32 %v1376_v37, %v598_v35  ;;  %v1738_v36 = vpop.permute.xlu1 %1737 }
 0x279   : > { %v1423_v52 = vsub.f32 0.0, %v2954_v48  ;;  %v1417_v53 = vadd.f32 %v2435_v34, %v1409_v51 }
 0x27a   : > { %v1424_v55 = vsub.f32 0.0, %v2956_v49  ;;  %v1418_v56 = vadd.f32 %v2436_v50, %v1409_v51  ;;  %v1745_v51 = vmul.bf16 0, %v1738_v36 }
 0x27b   : > { %v1435_v57 = vmul.f32 1.442695, %v1423_v52  ;;  %v1425_v58 = vsub.f32 0.0, %v1417_v53  ;;  %v1646_v41 = vpop.permute.xlu0 %1645 }
 0x27c   : > { %v1437_v59 = vmul.f32 1.442695, %v1424_v55  ;;  %v1426_v60 = vsub.f32 0.0, %v1418_v56  ;;  %v1880_v55 = vpop.permute.xlu1 %1879 }
 0x27d   : > { %2560 = vpow2.f32 %v1435_v57  ;;  %v1439_v61 = vmul.f32 1.442695, %v1425_v58 }
 0x27e   : > { %2562 = vpow2.f32 %v1437_v59  ;;  %v1441_v62 = vmul.f32 1.442695, %v1426_v60 }
 0x27f   : > { %v2553_v63 = vpop.eup %2552  ;;  %2564 = vpow2.f32 %v1439_v61  ;;  %v1740_v37 = vpop.permute.xlu0 %1739 }
 0x280   : > { %v2555_v0 = vpop.eup %2554  ;;  %v1443_v3 = vadd.f32 1.0, %v2553_v63  ;;  %2566 = vpow2.f32 %v1441_v62 }
 0x281   : > { %v2557_v4 = vpop.eup %2556  ;;  %v1444_v43 = vadd.f32 1.0, %v2555_v0 }
 0x282   : > { %v2559_v25 = vpop.eup %2558  ;;  %2568 = vrcp.f32 %v1443_v3  ;;  %v1445_v1 = vadd.f32 1.0, %v2557_v4  ;;  %v1968_v3 = vpop.permute.xlu1 %1967 }
 0x283   : > { %2570 = vrcp.f32 %v1444_v43  ;;  %v1446_v5 = vadd.f32 1.0, %v2559_v25 }
 0x284   : > { %2572 = vrcp.f32 %v1445_v1 }
 0x285   : > { %2574 = vrcp.f32 %v1446_v5 }
 0x287   : > { %v2561_v44 = vpop.eup %2560 }
 0x288   : > { %v2563_v6 = vpop.eup %2562  ;;  %v1447_v8 = vadd.f32 1.0, %v2561_v44  ;;  %v2517_v44 = vpop.permute.xlu1 %2516 }
 0x289   : > { %v2565_v9 = vpop.eup %2564  ;;  %v1448_v10 = vadd.f32 1.0, %v2563_v6 }
 0x28a   : > { %v2567_v11 = vpop.eup %2566  ;;  %2576 = vrcp.f32 %v1447_v8  ;;  %v1449_v12 = vadd.f32 1.0, %v2565_v9 }
 0x28b   : > { %2578 = vrcp.f32 %v1448_v10  ;;  %v1450_v13 = vadd.f32 1.0, %v2567_v11 }
 0x28c   : > { %v2569_v14 = vpop.eup %2568  ;;  %2580 = vrcp.f32 %v1449_v12  ;;  %v2132_v8 = vpop.permute.xlu1 %2131 }
 0x28d   : > { %v2571_v15 = vpop.eup %2570  ;;  %2582 = vrcp.f32 %v1450_v13  ;;  %v1459_v18 = vmul.f32 %v2569_v14, %v2942_v20  ;;  %v2139_v13 = vmul.bf16 0, %v2132_v8 }
 0x28e   : > { %v2573_v16 = vpop.eup %2572  ;;  %v1460_v21 = vmul.f32 %v2571_v15, %v2944_v22  ;;  %v1489_v22 = vsel %vm397_vm15, %v2932_v2, %v1488_v29  ;;  %v1647_v2 = vsel %vm623_vm9, %v2937_v7, %v1646_v41  ;;  %v2217_v15 = vld [vmem:[%s3153_s6] sm:$0xf] }
 0x28f   : > { %v2575_v17 = vpop.eup %2574  ;;  %v1461_v19 = vmul.f32 %v2573_v16, %v2947_v26 }
 0x290   : > { %v1462_v23 = vmul.f32 %v2575_v17, %v2950_v28  ;;  %v1586_v17 = vpop.permute.xlu1 %1585 }
 0x291   : > { %v2964_v24 = vpack.c.bf16 %v1461_v19, %v1459_v18 }
 0x292   : > { %v2966_v27 = vpack.c.bf16 %v1462_v23, %v1460_v21 }
 0x293   : > { %1510 = vrot.lane.b32.xlu1 %v2964_v24, %s2601_s17  ;;  %v1494_v28 = vmul.bf16 %v1489_v22, %v2964_v24  ;;  %v1652_v47 = vmul.bf16 %v1647_v2, %v2964_v24  ;;  %v1887_v62 = vmul.bf16 %v1880_v55, %v2964_v24  ;;  %v1975_v5 = vmul.bf16 %v1968_v3, %v2964_v24 }
 0x294   : > { %v2577_v30 = vpop.eup %2576  ;;  %v1495_v31 = vmul.bf16 %v1488_v29, %v2966_v27  ;;  %1512 = vrot.lane.b32.xlu0 %v2966_v27, %s2601_s17  ;;  %v1653_v45 = vmul.bf16 %v1646_v41, %v2966_v27  ;;  %v1747_v7 = vmul.bf16 %v1740_v37, %v2966_v27  ;;  %v1672_v19 = vpop.permute.xlu1 %1671 }
 0x295   : > { %v2579_v20 = vpop.eup %2578  ;;  %v1463_v33 = vmul.f32 %v2577_v30, %v2954_v48  ;;  %v1741_v48 = vsel %vm739_vm10, %v1738_v36, %v1740_v37 }
 0x296   : > { %v2581_v26 = vpop.eup %2580  ;;  %v1464_v39 = vmul.f32 %v2579_v20, %v2956_v49  ;;  %v1746_v34 = vmul.bf16 %v1741_v48, %v2964_v24 }
 0x297   : > { %v2583_v32 = vpop.eup %2582  ;;  %v1465_v38 = vmul.f32 %v2581_v26, %v1417_v53  ;;  %1583 = vrot.lane.b32.xlu1 %v1495_v31, %s2600_s16 }
 0x298   : > { %v1466_v40 = vmul.f32 %v2583_v32, %v1418_v56  ;;  %1581 = vrot.lane.b32.xlu0 %v1494_v28, %s2600_s16  ;;  %v1882_v56 = vpop.permute.xlu0 %1881 }
 0x299   : > { %v2980_v42 = vpack.c.bf16 %v1465_v38, %v1463_v33  ;;  %v1883_v57 = vsel %vm774_vm11, %v1880_v55, %v1882_v56  ;;  %v1889_v59 = vmul.bf16 0, %v1882_v56  ;;  %v2519_v33 = vunpack.i.h.bf16 %v2517_v44 }
 0x29a   : > { %v2985_v46 = vpack.c.bf16 %v1466_v40, %v1464_v39  ;;  %v1888_v58 = vmul.bf16 %v1883_v57, %v2966_v27 }
 0x29b   : > { %1669 = vrot.lane.b32.xlu1 %v1653_v45, %s2597_s14  ;;  %v1497_v35 = vmul.bf16 %v1489_v22, %v2980_v42  ;;  %v1655_v50 = vmul.bf16 %v1647_v2, %v2980_v42  ;;  %v1749_v52 = vmul.bf16 %v1741_v48, %v2980_v42  ;;  %v1890_v61 = vmul.bf16 %v1880_v55, %v2980_v42 }
 0x29c   : > { %1667 = vrot.lane.b32.xlu0 %v1652_v47, %s2597_s14  ;;  %v1498_v49 = vmul.bf16 %v1488_v29, %v2985_v46  ;;  %v1656_v53 = vmul.bf16 %v1646_v41, %v2985_v46  ;;  %v1750_v60 = vmul.bf16 %v1740_v37, %v2985_v46  ;;  %v1970_v63 = vpop.permute.xlu0 %1969  ;;  %v1978_v43 = vmul.bf16 %v1968_v3, %v2980_v42  ;;  %v2406_v47 = vld [vmem:[%s3152_s5 + $0x2] sm:$0x3] }
 0x29d   : > { %v1977_v0 = vmul.bf16 0, %v1970_v63  ;;  %v1971_v4 = vsel %vm658_vm12, %v1968_v3, %v1970_v63  ;;  %v1891_v1 = vmul.bf16 %v1883_v57, %v2985_v46  ;;  %v2518_v29 = vunpack.i.l.bf16 %v2517_v44 }
 0x29e   : > { %v1976_v25 = vmul.bf16 %v1971_v4, %v2966_v27  ;;  %v1979_v6 = vmul.bf16 %v1971_v4, %v2985_v46 }
 0x29f   : > { %1518 = vrot.lane.b32.xlu1 %v2985_v46, %s2601_s17 }
 0x2a0   : > { %1516 = vrot.lane.b32.xlu0 %v2980_v42, %s2601_s17  ;;  %v2130_v9 = vpop.permute.xlu0 %2129 }
 0x2a1   : > { %v2133_v10 = vsel %vm533_vm0, %v2130_v9, %v2132_v8  ;;  %v2137_v12 = vmul.bf16 %v2130_v9, %v2964_v24  ;;  %v2140_v16 = vmul.bf16 %v2130_v9, %v2980_v42 }
 0x2a2   : > { %v2138_v11 = vmul.bf16 %v2133_v10, %v2966_v27  ;;  %v2141_v14 = vmul.bf16 %v2133_v10, %v2985_v46 }
 0x2a3   : > { %1763 = vrot.lane.b32.xlu1 %v1747_v7, %s2595_s12 }
 0x2a4   : > { %1761 = vrot.lane.b32.xlu0 %v1746_v34, %s2595_s12  ;;  %v1580_v18 = vpop.permute.xlu0 %1579 }
 0x2a7   : > { %1587 = vrot.lane.b32.xlu1 %v1497_v35, %s2600_s16 }
 0x2a8   : > { %1589 = vrot.lane.b32.xlu0 %v1498_v49, %s2600_s16  ;;  %v1666_v21 = vpop.permute.xlu0 %1665 }
 0x2ab   : > { %1673 = vrot.lane.b32.xlu1 %v1655_v50, %s2597_s14 }
 0x2ac   : > { %1759 = vrot.lane.b32.xlu0 %v1745_v51, %s2595_s12 }
 0x2af   : > { %1767 = vrot.lane.b32.xlu1 %v1749_v52, %s2595_s12 }
 0x2b0   : > { %1675 = vrot.lane.b32.xlu0 %v1656_v53, %s2597_s14 }
 0x2b3   : > { %1765 = vrot.lane.b32.xlu1 %v1745_v51, %s2595_s12  ;;  %v1499_v51 = vld [vmem:[%s3152_s5] sm:$0x3] }
 0x2b4   : > { %1903 = vrot.lane.b32.xlu0 %v1888_v58, %s2596_s13 }
 0x2b7   : > { %1905 = vrot.lane.b32.xlu1 %v1889_v59, %s2596_s13 }
 0x2b8   : > { %1769 = vrot.lane.b32.xlu0 %v1750_v60, %s2595_s12 }
 0x2bb   : > { %1907 = vrot.lane.b32.xlu1 %v1890_v61, %s2596_s13  ;;  %v2409_v61 = vld [vmem:[%s3152_s5 + $0x4] sm:$0x3] }
 0x2bc   : > { %1901 = vrot.lane.b32.xlu0 %v1887_v62, %s2596_s13 }
 0x2bf   : > { %1993 = vrot.lane.b32.xlu1 %v1977_v0, %s2594_s11 }
 0x2c0   : > { %1911 = vrot.lane.b32.xlu0 %v1889_v59, %s2596_s13 }
 0x2c3   : > { %1995 = vrot.lane.b32.xlu1 %v1978_v43, %s2594_s11 }
 0x2c4   : > { %1991 = vrot.lane.b32.xlu0 %v1976_v25, %s2594_s11 }
 0x2c7   : > { %1909 = vrot.lane.b32.xlu1 %v1891_v1, %s2596_s13  ;;  %v2411_v1 = vld [vmem:[%s3152_s5 + $0x6] sm:$0x3]  ;;  %s298_s13 = scalar_lea.vmem %s3154_s7, %s2425_s30 }
 0x2c8   : > { %1989 = vrot.lane.b32.xlu0 %v1975_v5, %s2594_s11 }
 0x2cb   : > { %2521 = vrot.lane.b32.xlu1 %v2598_v54, %s2602_s18 }
 0x2cc   : > { %1999 = vrot.lane.b32.xlu0 %v1977_v0, %s2594_s11 }
 0x2cf   : > { %1997 = vrot.lane.b32.xlu1 %v1979_v6, %s2594_s11 }
 0x2d0   : > { %2065 = vrot.lane.b32.xlu0 %v2966_v27, %s2602_s18 }
 0x2d3   : > { %2071 = vrot.lane.b32.xlu1 %v2985_v46, %s2602_s18 }
 0x2d4   : > { %2063 = vrot.lane.b32.xlu0 %v2964_v24, %s2602_s18 }
 0x2d7   : > { %2153 = vrot.lane.b32.xlu1 %v2138_v11, %s2599_s15 }
 0x2d8   : > { %2069 = vrot.lane.b32.xlu0 %v2980_v42, %s2602_s18 }
 0x2db   : > { %2151 = vrot.lane.b32.xlu1 %v2137_v12, %s2599_s15 }
 0x2dc   : > { %2155 = vrot.lane.b32.xlu0 %v2139_v13, %s2599_s15 }
 0x2df   : > { %2161 = vrot.lane.b32.xlu1 %v2139_v13, %s2599_s15 }
 0x2e0   : > { %2159 = vrot.lane.b32.xlu0 %v2141_v14, %s2599_s15 }
 0x2e3   : > { %2220 = vperm.xlu1 %2514, %v2217_v15   ;;  %v2415_v15 = vld [vmem:[%s3152_s5 + $0xa] sm:$0x3] }
 0x2e4   : > { %2157 = vrot.lane.b32.xlu0 %v2140_v16, %s2599_s15 }
 0x305   : > { %v1511_v23 = vpop.permute.xlu1 %1510 }
 0x306   : > { %v1513_v30 = vpop.permute.xlu0 %1512  ;;  %v1520_v20 = vsel %vm436_vm1, %v2518_v29, %v1511_v23 }
 0x307   : > { %v1521_v31 = vsel %vm436_vm1, %v1511_v23, %v1513_v30 }
 0x308   : > { %1532 = vmatprep.subr.bf16.mxu1 %v1521_v31 }
 0x309   : > { %v1584_v22 = vpop.permute.xlu1 %1583  ;;  %1533 = vmatpush1.bf16.msra.mxu1 %v1520_v20  ;;  %v2417_v20 = vld [vmem:[%s3152_s5 + $0xc] sm:$0x3] }
 0x30a   : > { %v1582_v26 = vpop.permute.xlu0 %1581 }
 0x30b   : > { %v1592_v45 = vsel %vm533_vm0, %v1582_v26, %v1584_v22  ;;  %v1591_v37 = vsel %vm533_vm0, %v1580_v18, %v1582_v26 }
 0x30d   : > { %v1670_v28 = vpop.permute.xlu1 %1669 }
 0x30e   : > { %v1668_v32 = vpop.permute.xlu0 %1667 }
 0x30f   : > { %v1678_v50 = vsel %vm658_vm12, %v1668_v32, %v1670_v28  ;;  %v1677_v53 = vsel %vm658_vm12, %v1666_v21, %v1668_v32 }
 0x311   : > { %v1519_v38 = vpop.permute.xlu1 %1518 }
 0x312   : > { %v1517_v39 = vpop.permute.xlu0 %1516 }
 0x313   : > { %v1522_v40 = vsel %vm436_vm1, %v2519_v33, %v1517_v39  ;;  %v1523_v41 = vsel %vm436_vm1, %v1517_v39, %v1519_v38 }
 0x314   : > { %1534 = vmatprep.subr.bf16.mxu1 %v1523_v41  ;;  %v2419_v41 = vld [vmem:[%s3152_s5 + $0xe] sm:$0x3] }
 0x315   : > { %v1764_v2 = vpop.permute.xlu1 %1763  ;;  %1535 = vmatpush1.bf16.msra.mxu1 %v1522_v40 }
 0x316   : > { %1602 = vmatprep.subr.bf16.mxu1 %v1592_v45  ;;  %v1762_v36 = vpop.permute.xlu0 %1761 }
 0x317   : > { %v1772_v60 = vsel %vm774_vm11, %v1762_v36, %v1764_v2 }
 0x318   : > { %2407 = vmatmul.mubr.msk.bf16.vlgmr.msra.gmra.mrb[8].mxu1 %vm1528_vm3, %v2406_v47 }
 0x319   : > { %v1588_v48 = vpop.permute.xlu1 %1587  ;;  %1603 = vmatpush1.bf16.msra.mxu1 %v1591_v37  ;;  %1634 = vmatprep.mubr.bf16.mxu1 %v2598_v54 }
 0x31a   : > { %v1590_v7 = vpop.permute.xlu0 %1589  ;;  %v1593_v35 = vsel %vm533_vm0, %v1586_v17, %v1588_v48 }
 0x31b   : > { %v1594_v34 = vsel %vm533_vm0, %v1588_v48, %v1590_v7 }
 0x31c   : > { %1604 = vmatprep.subr.bf16.mxu1 %v1594_v34 }
 0x31d   : > { %v1674_v49 = vpop.permute.xlu1 %1673  ;;  %1605 = vmatpush1.bf16.msra.mxu1 %v1593_v35  ;;  %v2421_v35 = vld [vmem:[%s3152_s5 + $0x10] sm:$0x3] }
 0x31e   : > { %1688 = vmatprep.subr.bf16.mxu1 %v1678_v50  ;;  %v1760_v52 = vpop.permute.xlu0 %1759  ;;  %v1679_v58 = vsel %vm658_vm12, %v1672_v19, %v1674_v49 }
 0x31f   : > { %v1771_v63 = vsel %vm774_vm11, %v1760_v52, %v1762_v36 }
 0x320   : > { %2408 = vmatmul.mubr.msk.bf16.vlgmr.msra.gmra.mrb[12].mxu1 %vm1528_vm3, %v1499_v51 }
 0x321   : > { %v1768_v55 = vpop.permute.xlu1 %1767  ;;  %1689 = vmatpush1.bf16.msra.mxu1 %v1677_v53  ;;  %1720 = vmatprep.mubr.bf16.mxu1 %v2598_v54 }
 0x322   : > { %v1676_v56 = vpop.permute.xlu0 %1675 }
 0x323   : > { %v1680_v57 = vsel %vm658_vm12, %v1674_v49, %v1676_v56 }
 0x324   : > { %1690 = vmatprep.subr.bf16.mxu1 %v1680_v57 }
 0x325   : > { %v1766_v59 = vpop.permute.xlu1 %1765  ;;  %1691 = vmatpush1.bf16.msra.mxu1 %v1679_v58 }
 0x326   : > { %1782 = vmatprep.subr.bf16.mxu1 %v1772_v60  ;;  %v1904_v62 = vpop.permute.xlu0 %1903  ;;  %v1773_v43 = vsel %vm774_vm11, %v1766_v59, %v1768_v55 }
 0x328   : > { %2410 = vmatmul.mubr.msk.bf16.vlgmr.msra.gmra.mrb[16].mxu1 %vm1528_vm3, %v2409_v61 }
 0x329   : > { %v1906_v0 = vpop.permute.xlu1 %1905  ;;  %1783 = vmatpush1.bf16.msra.mxu1 %v1771_v63  ;;  %1814 = vmatprep.mubr.bf16.mxu1 %v2598_v54 }
 0x32a   : > { %v1770_v3 = vpop.permute.xlu0 %1769  ;;  %v1914_v9 = vsel %vm739_vm10, %v1904_v62, %v1906_v0 }
 0x32b   : > { %v1774_v4 = vsel %vm774_vm11, %v1768_v55, %v1770_v3 }
 0x32c   : > { %1784 = vmatprep.subr.bf16.mxu1 %v1774_v4 }
 0x32d   : > { %v1908_v25 = vpop.permute.xlu1 %1907  ;;  %1785 = vmatpush1.bf16.msra.mxu1 %v1773_v43 }
 0x32e   : > { %1830 = vmatprep.subr.bf16.mxu1 %v2966_v27  ;;  %v1902_v5 = vpop.permute.xlu0 %1901  ;;  %v2413_v27 = vld [vmem:[%s3152_s5 + $0x8] sm:$0x3] }
 0x32f   : > { %v1913_v11 = vsel %vm739_vm10, %v1902_v5, %v1904_v62 }
 0x330   : > { %2412 = vmatmul.mubr.msk.bf16.vlgmr.msra.gmra.mrb[20].mxu1 %vm1528_vm3, %v2411_v1 }
 0x331   : > { %v1994_v44 = vpop.permute.xlu1 %1993  ;;  %1831 = vmatpush1.bf16.msra.mxu1 %v2964_v24  ;;  %1862 = vmatprep.mubr.bf16.mxu1 %v2598_v54 }
 0x332   : > { %1832 = vmatprep.subr.bf16.mxu1 %v2985_v46  ;;  %v1912_v6 = vpop.permute.xlu0 %1911 }
 0x335   : > { %v1996_v8 = vpop.permute.xlu1 %1995  ;;  %1833 = vmatpush1.bf16.msra.mxu1 %v2980_v42 }
 0x336   : > { %1924 = vmatprep.subr.bf16.mxu1 %v1914_v9  ;;  %v1992_v10 = vpop.permute.xlu0 %1991 }
 0x337   : > { %v2002_v14 = vsel %vm623_vm9, %v1992_v10, %v1994_v44 }
 0x338   : > { %2414 = vmatmul.mubr.msk.bf16.vlgmr.msra.gmra.mrb[24].mxu1 %vm1528_vm3, %v2413_v27 }
 0x339   : > { %v1910_v24 = vpop.permute.xlu1 %1909  ;;  %1925 = vmatpush1.bf16.msra.mxu1 %v1913_v11  ;;  %1956 = vmatprep.mubr.bf16.mxu1 %v2598_v54 }
 0x33a   : > { %v1990_v46 = vpop.permute.xlu0 %1989  ;;  %v1916_v12 = vsel %vm739_vm10, %v1910_v24, %v1912_v6  ;;  %v1915_v42 = vsel %vm739_vm10, %v1908_v25, %v1910_v24 }
 0x33b   : > { %1926 = vmatprep.subr.bf16.mxu1 %v1916_v12  ;;  %v2001_v17 = vsel %vm623_vm9, %v1990_v46, %v1992_v10 }
 0x33d   : > { %v2522_v13 = vpop.permute.xlu1 %2521  ;;  %1927 = vmatpush1.bf16.msra.mxu1 %v1915_v42 }
 0x33e   : > { %2012 = vmatprep.subr.bf16.mxu1 %v2002_v14  ;;  %v2000_v16 = vpop.permute.xlu0 %1999  ;;  %v2523_v18 = vunpack.i.l.bf16 %v2522_v13  ;;  %v2524_v26 = vunpack.i.h.bf16 %v2522_v13 }
 0x340   : > { %2416 = vmatmul.mubr.msk.bf16.vlgmr.msra.gmra.mrb[28].mxu1 %vm1528_vm3, %v2415_v15 }
 0x341   : > { %v1998_v19 = vpop.permute.xlu1 %1997  ;;  %2013 = vmatpush1.bf16.msra.mxu1 %v2001_v17  ;;  %2044 = vmatprep.mubr.bf16.mxu1 %v2598_v54 }
 0x342   : > { %v2066_v21 = vpop.permute.xlu0 %2065  ;;  %v2004_v23 = vsel %vm623_vm9, %v1998_v19, %v2000_v16  ;;  %v2003_v29 = vsel %vm623_vm9, %v1996_v8, %v1998_v19 }
 0x343   : > { %2014 = vmatprep.subr.bf16.mxu1 %v2004_v23  ;;  %v2076_v31 = vsel %vm1199_vm2, %v2066_v21, %v2523_v18 }
 0x345   : > { %v2072_v30 = vpop.permute.xlu1 %2071  ;;  %2015 = vmatpush1.bf16.msra.mxu1 %v2003_v29 }
 0x346   : > { %2086 = vmatprep.subr.bf16.mxu1 %v2076_v31  ;;  %v2064_v22 = vpop.permute.xlu0 %2063  ;;  %v2078_v33 = vsel %vm1199_vm2, %v2072_v30, %v2524_v26 }
 0x347   : > { %v2075_v28 = vsel %vm1199_vm2, %v2064_v22, %v2066_v21 }
 0x348   : > { %2418 = vmatmul.mubr.msk.bf16.vlgmr.msra.gmra.mrb[32].mxu1 %vm1528_vm3, %v2417_v20 }
 0x349   : > { %v2154_v32 = vpop.permute.xlu1 %2153  ;;  %2087 = vmatpush1.bf16.msra.mxu1 %v2075_v28  ;;  %2118 = vmatprep.mubr.bf16.mxu1 %v2598_v54 }
 0x34a   : > { %2088 = vmatprep.subr.bf16.mxu1 %v2078_v33  ;;  %v2070_v38 = vpop.permute.xlu0 %2069 }
 0x34b   : > { %v2077_v39 = vsel %vm1199_vm2, %v2070_v38, %v2072_v30 }
 0x34d   : > { %v2152_v40 = vpop.permute.xlu1 %2151  ;;  %2089 = vmatpush1.bf16.msra.mxu1 %v2077_v39 }
 0x34e   : > { %v2156_v2 = vpop.permute.xlu0 %2155  ;;  %v2163_v47 = vsel %vm397_vm15, %v2152_v40, %v2154_v32 }
 0x34f   : > { %v2164_v45 = vsel %vm397_vm15, %v2154_v32, %v2156_v2 }
 0x350   : > { %2420 = vmatmul.mubr.msk.bf16.vlgmr.msra.gmra.mrb[36].mxu1 %vm1528_vm3, %v2419_v41  ;;  %2174 = vmatprep.subr.bf16.mxu1 %v2164_v45 }
 0x351   : > { %2175 = vmatpush1.bf16.msra.mxu1 %v2163_v47  ;;  %v2162_v36 = vpop.permute.xlu1 %2161  ;;  %2206 = vmatprep.mubr.bf16.mxu1 %v2598_v54 }
 0x352   : > { %v2160_v37 = vpop.permute.xlu0 %2159 }
 0x353   : > { %v2166_v48 = vsel %vm397_vm15, %v2160_v37, %v2162_v36 }
 0x354   : > { %2176 = vmatprep.subr.bf16.mxu1 %v2166_v48 }
 0x356   : > { %v2158_v7 = vpop.permute.xlu0 %2157 }
 0x357   : > { %v2165_v34 = vsel %vm397_vm15, %v2158_v7, %v2160_v37 }
 0x358   : > { %2177 = vmatpush1.bf16.msra.mxu1 %v2165_v34 }
 0x35b   : > { %2422 = vmatmul.mubr.msk.bf16.vlgmr.msra.gmra.mrb[40].mxu1 %vm1528_vm3, %v2421_v35 }
 0x362   : > { %v2221_v32 = vpop.permute.xlu1 %2220 }
 0x3eb   : > { %v1566_v49 = vpop.f32.mrb[8].mxu1 }
 0x3ec   : > { %v1568_v50 = vpop.f32.mrb[9].mxu1 }
 0x3ed   : > { %v1570_v51 = vpop.f32.mrb[10].mxu1 }
 0x3ee   : > { %v1571_v52 = vpop.f32.mrb[11].mxu1 }
 0x3f3   : > { %v1636_v53 = vpop.f32.mrb[12].mxu1 }
 0x3f4   : > { %v1637_v54 = vadd.f32 %v1636_v53, %v1566_v49  ;;  %v1638_v55 = vpop.f32.mrb[13].mxu1 }
 0x3f5   : > { %v1639_v56 = vadd.f32 %v1638_v55, %v1568_v50  ;;  %v1640_v57 = vpop.f32.mrb[14].mxu1 }
 0x3f6   : > { %v1641_v58 = vpop.f32.mrb[15].mxu1 }
 0x3fb   : > { %v1722_v59 = vpop.f32.mrb[16].mxu1 }
 0x3fc   : > { %v1729_v60 = vadd.f32 %v1722_v59, %v1637_v54  ;;  %v1724_v61 = vpop.f32.mrb[17].mxu1 }
 0x3fd   : > { %v1730_v62 = vadd.f32 %v1724_v61, %v1639_v56  ;;  %v1726_v63 = vpop.f32.mrb[18].mxu1 }
 0x3fe   : > { %v1727_v0 = vpop.f32.mrb[19].mxu1 }
 0x403   : > { %v1816_v3 = vpop.f32.mrb[20].mxu1 }
 0x404   : > { %v1823_v4 = vadd.f32 %v1816_v3, %v1729_v60  ;;  %v1818_v43 = vpop.f32.mrb[21].mxu1 }
 0x405   : > { %v1824_v25 = vadd.f32 %v1818_v43, %v1730_v62  ;;  %v1820_v1 = vpop.f32.mrb[22].mxu1 }
 0x406   : > { %v1821_v5 = vpop.f32.mrb[23].mxu1 }
 0x40b   : > { %v1864_v44 = vpop.f32.mrb[24].mxu1 }
 0x40c   : > { %v1871_v6 = vadd.f32 %v1864_v44, %v1823_v4  ;;  %v1866_v8 = vpop.f32.mrb[25].mxu1 }
 0x40d   : > { %v1872_v9 = vadd.f32 %v1866_v8, %v1824_v25  ;;  %v1868_v27 = vpop.f32.mrb[26].mxu1 }
 0x40e   : > { %v1869_v10 = vpop.f32.mrb[27].mxu1 }
 0x413   : > { %v1958_v11 = vpop.f32.mrb[28].mxu1 }
 0x414   : > { %v1965_v24 = vadd.f32 %v1958_v11, %v1871_v6  ;;  %v1960_v46 = vpop.f32.mrb[29].mxu1 }
 0x415   : > { %v1966_v12 = vadd.f32 %v1960_v46, %v1872_v9  ;;  %v1962_v42 = vpop.f32.mrb[30].mxu1 }
 0x416   : > { %v1963_v13 = vpop.f32.mrb[31].mxu1 }
 0x41b   : > { %v2046_v14 = vpop.f32.mrb[32].mxu1 }
 0x41c   : > { %v2053_v15 = vadd.f32 %v2046_v14, %v1965_v24  ;;  %v2048_v16 = vpop.f32.mrb[33].mxu1 }
 0x41d   : > { %v2054_v17 = vadd.f32 %v2048_v16, %v1966_v12  ;;  %v2050_v18 = vpop.f32.mrb[34].mxu1 }
 0x41e   : > { %v2051_v19 = vpop.f32.mrb[35].mxu1 }
 0x423   : > { %v2120_v21 = vpop.f32.mrb[36].mxu1 }
 0x424   : > { %v2127_v23 = vadd.f32 %v2120_v21, %v2053_v15  ;;  %v2122_v29 = vpop.f32.mrb[37].mxu1 }
 0x425   : > { %v2128_v30 = vadd.f32 %v2122_v29, %v2054_v17  ;;  %v2124_v31 = vpop.f32.mrb[38].mxu1 }
 0x426   : > { %v2125_v20 = vpop.f32.mrb[39].mxu1 }
 0x42e   : > { %v2208_v22 = vpop.f32.mrb[40].mxu1 }
 0x42f   : > { %v2215_v26 = vadd.f32 %v2208_v22, %v2127_v23  ;;  %v2210_v28 = vpop.f32.mrb[41].mxu1 }
 0x430   : > { %v2216_v33 = vadd.f32 %v2210_v28, %v2128_v30  ;;  %v2212_v38 = vpop.f32.mrb[42].mxu1 }
 0x431   : > { %v2223_v39 = vadd.f32 %v2221_v32, %v2215_v26  ;;  %v2213_v40 = vpop.f32.mrb[43].mxu1 }
 0x432   : > { %v2224_v41 = vadd.f32 %v2221_v32, %v2216_v33 }
 0x434   : > { %v2227_v2 = vcombine.low %v2223_v39, %v2224_v41 }
 0x436   : > { %2229 = vst [vmem:[%s298_s13] sm:$0xff] %v2227_v2 }
 0x437 PF: > { %s17_s24 = sadd.s32 1, %s2590_s24  }
 0x438   : > { %p14_p4 = scmp.ge.s32.totalorder %s17_s24, 4  }
 0x43a   :  { %16 = sbr.rel (!%p14_p4) target bundleno = 1 (0x1), region = 97 }

</bundles_post_ra>
